<compile_context>
chip_gen: v7x
topology: tpu7x:2x2x1
jax: 0.10.0
libtpu: 0.0.40
codegen_flags: <defaults>
</compile_context>

<pallas_src>
from functools import partial

import jax
import jax.numpy as jnp
from jax.experimental import pallas as pl
from jax.experimental.pallas import tpu as pltpu


def _round_up(x, m):
    return (x + m - 1) // m * m


# ------------------------------ Pallas kernel --------------------------------

def _bottleneck_kernel(H, W, x_ref, w1_ref, b1_ref, w2_ref, b2_ref,
                       w3_ref, b3_ref, o_ref, t1_pad_ref):
    """Fused bottleneck for one image.

    x_ref      : (1, H*W, Cin_p)  bf16  channels-last, spatially flattened
    w1_ref     : (Cin_p, Wd_p)    bf16  conv1 weight with bn1 scale folded in
    b1_ref     : (1, Wd_p)        f32   bn1 shift
    w2_ref     : (9, Wd_p, Wd_p)  bf16  3x3 taps (ky*3+kx) with bn2 scale folded
    b2_ref     : (1, Wd_p)        f32   bn2 shift
    w3_ref     : (Wd_p, Cout_p)   bf16  conv3 weight with bn3 scale folded in
    b3_ref     : (1, Cout_p)      f32   bn3 shift
    o_ref      : (1, H*W, Cout_p) bf16  output
    t1_pad_ref : (H+2, W+16, Wd_p) f32 VMEM scratch, zero-padded staging buffer
                 for the 3x3 halo taps (interior at column offset 8 so the
                 interior store stays sublane-aligned).
    """
    HW = H * W
    Cw = w1_ref.shape[1]

    xb = x_ref[0]                                          # (HW, Cin_p) bf16

    # ---- conv1 (1x1) + bn1 + relu -------------------------------------------
    t1 = jnp.dot(xb, w1_ref[...], preferred_element_type=jnp.float32)
    t1 = jnp.maximum(t1 + b1_ref[...], 0.0)                # (HW, Cw) f32

    # ---- stage t1 into the zero-padded VMEM scratch (3x3 halo) --------------
    t1_pad_ref[...] = jnp.zeros_like(t1_pad_ref)
    t1_pad_ref[1:H + 1, 8:8 + W, :] = t1.reshape(H, W, Cw)

    # ---- conv2 (3x3 'SAME', stride 1) as 9 shifted matmuls, f32 accumulate --
    acc = jnp.zeros((HW, Cw), jnp.float32)
    for k in range(9):
        ky, kx = k // 3, k % 3
        tap = t1_pad_ref[ky:ky + H, 7 + kx:7 + kx + W, :]  # (H, W, Cw) f32
        tap = tap.reshape(HW, Cw).astype(jnp.bfloat16)
        acc = acc + jnp.dot(tap, w2_ref[k],
                            preferred_element_type=jnp.float32)
    t2 = jnp.maximum(acc + b2_ref[...], 0.0).astype(jnp.bfloat16)

    # ---- conv3 (1x1) + bn3 + identity add + relu ----------------------------
    y = jnp.dot(t2, w3_ref[...], preferred_element_type=jnp.float32)
    y = y + b3_ref[...] + xb.astype(jnp.float32)
    o_ref[0] = jnp.maximum(y, 0.0).astype(o_ref.dtype)


# ------------------------------- JAX wrapper ----------------------------------

def bottleneck_forward(x_nchw, params, out_dtype=jnp.bfloat16):
    """Bottleneck forward.  x_nchw: [N, Cin, H, W] (PyTorch layout), f32."""
    w1, s1, b1, w2, s2, b2, w3, s3, b3 = params
    N, Cin, H, W = x_nchw.shape
    width = w1.shape[1]
    Cout = w3.shape[1]
    assert Cout == Cin, "downsample is None -> identity add requires Cin == Cout"

    HW = H * W
    Cin_p = _round_up(Cin, 128)
    Wd_p = _round_up(width, 128)
    Cout_p = _round_up(Cout, 128)
    assert Cin_p == Cout_p

    # Single NCHW -> NHWC transpose at the module boundary; bf16 activations,
    # channels zero-padded to a lane-dense multiple of 128.
    x = jnp.transpose(x_nchw, (0, 2, 3, 1)).astype(jnp.bfloat16)
    x = jnp.pad(x, ((0, 0), (0, 0), (0, 0), (0, Cin_p - Cin)))
    x = x.reshape(N, HW, Cin_p)

    # Fold BN scale into the conv weights (y = x @ (w*s) + shift), pad, cast.
    w1f = jnp.pad(w1 * s1, ((0, Cin_p - Cin), (0, Wd_p - width))).astype(jnp.bfloat16)
    b1p = jnp.pad(b1, ((0, 0), (0, Wd_p - width)))
    w2f = w2 * s2.reshape(1, 1, 1, width)
    w2f = jnp.pad(w2f, ((0, 0), (0, 0), (0, Wd_p - width), (0, Wd_p - width)))
    w2f = w2f.reshape(9, Wd_p, Wd_p).astype(jnp.bfloat16)
    b2p = jnp.pad(b2, ((0, 0), (0, Wd_p - width)))
    w3f = jnp.pad(w3 * s3, ((0, Wd_p - width), (0, Cout_p - Cout))).astype(jnp.bfloat16)
    b3p = jnp.pad(b3, ((0, 0), (0, Cout_p - Cout)))

    flops = 2 * N * HW * (Cin_p * Wd_p + 9 * Wd_p * Wd_p + Wd_p * Cout_p)
    bytes_accessed = (x.size * 2 + N * HW * Cout_p * jnp.dtype(out_dtype).itemsize
                      + (w1f.size + w2f.size + w3f.size) * 2
                      + (b1p.size + b2p.size + b3p.size) * 4)

    out = pl.pallas_call(
        partial(_bottleneck_kernel, H, W),
        out_shape=jax.ShapeDtypeStruct((N, HW, Cout_p), out_dtype),
        grid=(N,),
        in_specs=[
            pl.BlockSpec((1, HW, Cin_p), lambda n: (n, 0, 0)),
            pl.BlockSpec((Cin_p, Wd_p), lambda n: (0, 0)),
            pl.BlockSpec((1, Wd_p), lambda n: (0, 0)),
            pl.BlockSpec((9, Wd_p, Wd_p), lambda n: (0, 0, 0)),
            pl.BlockSpec((1, Wd_p), lambda n: (0, 0)),
            pl.BlockSpec((Wd_p, Cout_p), lambda n: (0, 0)),
            pl.BlockSpec((1, Cout_p), lambda n: (0, 0)),
        ],
        out_specs=pl.BlockSpec((1, HW, Cout_p), lambda n: (n, 0, 0)),
        scratch_shapes=[pltpu.VMEM((H + 2, W + 16, Wd_p), jnp.float32)],
        compiler_params=pltpu.CompilerParams(
            dimension_semantics=("parallel",),
            vmem_limit_bytes=32 * 1024 * 1024),
        cost_estimate=pl.CostEstimate(flops=int(flops), transcendentals=0,
                                      bytes_accessed=int(bytes_accessed)),
    )(x, w1f, b1p, w2f, b2p, w3f, b3p)

    out = out.reshape(N, H, W, Cout_p)[:, :, :, :Cout]
    return jnp.transpose(out, (0, 3, 1, 2))                 # back to NCHW


# --------------------------- pure-JAX reference -------------------------------
# Mirrors the kernel's precision strategy (bf16 matmul operands, f32 accumulate,
# bf16 activations) so the comparison is tight.

def reference(x_nchw, params):
    w1, s1, b1, w2, s2, b2, w3, s3, b3 = params
    x = jnp.transpose(x_nchw, (0, 2, 3, 1)).astype(jnp.bfloat16)

    def conv(y, w):
        return jax.lax.conv_general_dilated(
            y, w, (1, 1), "SAME",
            dimension_numbers=("NHWC", "HWIO", "NHWC"),
            preferred_element_type=jnp.float32)

    w1f = (w1 * s1).astype(jnp.bfloat16)
    w2f = (w2 * s2.reshape(1, 1, 1, -1)).astype(jnp.bfloat16)
    w3f = (w3 * s3).astype(jnp.bfloat16)

    t1 = jax.nn.relu(conv(x, w1f[None, None]) + b1).astype(jnp.bfloat16)
    t2 = jax.nn.relu(conv(t1, w2f) + b2).astype(jnp.bfloat16)
    t3 = conv(t2, w3f[None, None]) + b3 + x.astype(jnp.float32)
    out = jax.nn.relu(t3).astype(jnp.bfloat16)
    return jnp.transpose(out, (0, 3, 1, 2))


# ---------------------------------- main ---------------------------------------

if __name__ == "__main__":
    key = jax.random.PRNGKey(0)
    keys = jax.random.split(key, 16)

    # Small shapes consistent with the module: inplanes = planes * expansion.
    N, H, W = 2, 16, 16
    planes = 8
    width = planes                      # base_width=64, groups=1 -> width = planes
    Cin = planes * 4                    # = Cout, so the identity add is valid
    Cout = planes * 4

    x = jax.random.normal(keys[0], (N, Cin, H, W), jnp.float32)

    def bn_fold(kg, kb, km, kv, C, eps=1e-5):
        gamma = 1.0 + 0.1 * jax.random.normal(kg, (C,), jnp.float32)
        beta = 0.1 * jax.random.normal(kb, (C,), jnp.float32)
        mean = 0.1 * jax.random.normal(km, (C,), jnp.float32)
        var = jnp.abs(jax.random.normal(kv, (C,), jnp.float32)) + 0.5
        scale = gamma / jnp.sqrt(var + eps)
        shift = beta - mean * scale
        return scale.reshape(1, C), shift.reshape(1, C)

    w1 = 0.1 * jax.random.normal(keys[1], (Cin, width), jnp.float32)
    s1, b1 = bn_fold(keys[2], keys[3], keys[4], keys[5], width)
    w2 = 0.1 * jax.random.normal(keys[6], (3, 3, width, width), jnp.float32)
    s2, b2 = bn_fold(keys[7], keys[8], keys[9], keys[10], width)
    w3 = 0.1 * jax.random.normal(keys[11], (width, Cout), jnp.float32)
    s3, b3 = bn_fold(keys[12], keys[13], keys[14], keys[15], Cout)

    params = (w1, s1, b1, w2, s2, b2, w3, s3, b3)

    fwd = jax.jit(bottleneck_forward)
    out = fwd(x, params)
    out = jax.block_until_ready(out)

    ref = reference(x, params)
    assert out.shape == (N, Cout, H, W), out.shape
    out_f32 = out.astype(jnp.float32)
    ref_f32 = ref.astype(jnp.float32)
    max_err = float(jnp.max(jnp.abs(out_f32 - ref_f32)))
    assert jnp.allclose(out_f32, ref_f32, rtol=2e-2, atol=2e-2), max_err

    print("KERNEL_OK")
</pallas_src>

<mosaic_0001>
module attributes {stable_mosaic.version = 11 : i64} {
  func.func @_bottleneck_kernel(%arg0: i32, %arg1: memref<1x256x128xbf16, #tpu.memory_space<vmem>>, %arg2: memref<128x128xbf16, #tpu.memory_space<vmem>>, %arg3: memref<1x128xf32, #tpu.memory_space<vmem>>, %arg4: memref<9x128x128xbf16, #tpu.memory_space<vmem>>, %arg5: memref<1x128xf32, #tpu.memory_space<vmem>>, %arg6: memref<128x128xbf16, #tpu.memory_space<vmem>>, %arg7: memref<1x128xf32, #tpu.memory_space<vmem>>, %arg8: memref<1x256x128xbf16, #tpu.memory_space<vmem>>, %arg9: memref<18x32x128xf32, #tpu.memory_space<vmem>>) attributes {dimension_semantics = [#tpu.dimension_semantics<parallel>], iteration_bounds = array<i64: 2>, scalar_prefetch = 0 : i64, scratch_operands = 1 : i64, tpu.core_type = #tpu.core_type<tc>, window_params = [{transform_indices = @transform_0, window_bounds = array<i64: 1, 256, 128>}, {pipeline_mode = #tpu.pipeline_mode<synchronous>, transform_indices = @transform_1, window_bounds = array<i64: 128, 128>}, {pipeline_mode = #tpu.pipeline_mode<synchronous>, transform_indices = @transform_2, window_bounds = array<i64: 1, 128>}, {pipeline_mode = #tpu.pipeline_mode<synchronous>, transform_indices = @transform_3, window_bounds = array<i64: 9, 128, 128>}, {pipeline_mode = #tpu.pipeline_mode<synchronous>, transform_indices = @transform_4, window_bounds = array<i64: 1, 128>}, {pipeline_mode = #tpu.pipeline_mode<synchronous>, transform_indices = @transform_5, window_bounds = array<i64: 128, 128>}, {pipeline_mode = #tpu.pipeline_mode<synchronous>, transform_indices = @transform_6, window_bounds = array<i64: 1, 128>}, {transform_indices = @transform_7, window_bounds = array<i64: 1, 256, 128>}]} {
    %c0 = arith.constant 0 : index
    %c0_0 = arith.constant 0 : index
    %c0_1 = arith.constant 0 : index
    %0 = vector.load %arg1[%c0, %c0_0, %c0_1] : memref<1x256x128xbf16, #tpu.memory_space<vmem>>, vector<1x256x128xbf16>
    %1 = vector.shape_cast %0 : vector<1x256x128xbf16> to vector<256x128xbf16>
    %c0_2 = arith.constant 0 : index
    %c0_3 = arith.constant 0 : index
    %2 = vector.load %arg2[%c0_2, %c0_3] : memref<128x128xbf16, #tpu.memory_space<vmem>>, vector<128x128xbf16>
    %cst = arith.constant dense<0.000000e+00> : vector<256x128xf32>
    %3 = tpu.matmul %1, %2, %cst {dimension_numbers = #tpu.dot_dimension_numbers<[1], [0], [0], [1], [0, 0, 1, 1], [], []>} : vector<256x128xbf16>, vector<128x128xbf16>, vector<256x128xf32> -> vector<256x128xf32>
    %c0_4 = arith.constant 0 : index
    %c0_5 = arith.constant 0 : index
    %4 = vector.load %arg3[%c0_4, %c0_5] : memref<1x128xf32, #tpu.memory_space<vmem>>, vector<1x128xf32>
    %5 = vector.broadcast %4 : vector<1x128xf32> to vector<256x128xf32>
    %6 = arith.addf %3, %5 : vector<256x128xf32>
    %cst_6 = arith.constant 0.000000e+00 : f32
    %7 = vector.broadcast %cst_6 : f32 to vector<256x128xf32>
    %8 = arith.maximumf %6, %7 : vector<256x128xf32>
    %cst_7 = arith.constant 0.000000e+00 : f32
    %9 = vector.broadcast %cst_7 : f32 to vector<18x32x128xf32>
    %c0_8 = arith.constant 0 : index
    %c0_9 = arith.constant 0 : index
    %c0_10 = arith.constant 0 : index
    %10 = vector.load %arg9[%c0_8, %c0_9, %c0_10] : memref<18x32x128xf32, #tpu.memory_space<vmem>>, vector<18x32x128xf32>
    tpu.vector_store %arg9[%c0_8, %c0_9, %c0_10], %9 {strides = array<i32>} : memref<18x32x128xf32, #tpu.memory_space<vmem>>, vector<18x32x128xf32>,
    %11 = vector.shape_cast %8 : vector<256x128xf32> to vector<16x16x128xf32>
    %c1 = arith.constant 1 : index
    %c8 = arith.constant 8 : index
    %c0_11 = arith.constant 0 : index
    %12 = vector.load %arg9[%c1, %c8, %c0_11] : memref<18x32x128xf32, #tpu.memory_space<vmem>>, vector<16x16x128xf32>
    tpu.vector_store %arg9[%c1, %c8, %c0_11], %11 {strides = array<i32>} : memref<18x32x128xf32, #tpu.memory_space<vmem>>, vector<16x16x128xf32>,
    %cst_12 = arith.constant 0.000000e+00 : f32
    %13 = vector.broadcast %cst_12 : f32 to vector<256x128xf32>
    %c0_13 = arith.constant 0 : index
    %c7 = arith.constant 7 : index
    %c0_14 = arith.constant 0 : index
    %14 = vector.load %arg9[%c0_13, %c7, %c0_14] : memref<18x32x128xf32, #tpu.memory_space<vmem>>, vector<16x16x128xf32>
    %15 = vector.shape_cast %14 : vector<16x16x128xf32> to vector<256x128xf32>
    %16 = arith.truncf %15 : vector<256x128xf32> to vector<256x128xbf16>
    %c0_15 = arith.constant 0 : index
    %c0_16 = arith.constant 0 : index
    %c0_17 = arith.constant 0 : index
    %17 = vector.load %arg4[%c0_15, %c0_16, %c0_17] : memref<9x128x128xbf16, #tpu.memory_space<vmem>>, vector<1x128x128xbf16>
    %18 = vector.shape_cast %17 : vector<1x128x128xbf16> to vector<128x128xbf16>
    %cst_18 = arith.constant dense<0.000000e+00> : vector<256x128xf32>
    %19 = tpu.matmul %16, %18, %cst_18 {dimension_numbers = #tpu.dot_dimension_numbers<[1], [0], [0], [1], [0, 0, 1, 1], [], []>} : vector<256x128xbf16>, vector<128x128xbf16>, vector<256x128xf32> -> vector<256x128xf32>
    %20 = arith.addf %13, %19 : vector<256x128xf32>
    %c0_19 = arith.constant 0 : index
    %c8_20 = arith.constant 8 : index
    %c0_21 = arith.constant 0 : index
    %21 = vector.load %arg9[%c0_19, %c8_20, %c0_21] : memref<18x32x128xf32, #tpu.memory_space<vmem>>, vector<16x16x128xf32>
    %22 = vector.shape_cast %21 : vector<16x16x128xf32> to vector<256x128xf32>
    %23 = arith.truncf %22 : vector<256x128xf32> to vector<256x128xbf16>
    %c1_22 = arith.constant 1 : index
    %c0_23 = arith.constant 0 : index
    %c0_24 = arith.constant 0 : index
    %24 = vector.load %arg4[%c1_22, %c0_23, %c0_24] : memref<9x128x128xbf16, #tpu.memory_space<vmem>>, vector<1x128x128xbf16>
    %25 = vector.shape_cast %24 : vector<1x128x128xbf16> to vector<128x128xbf16>
    %cst_25 = arith.constant dense<0.000000e+00> : vector<256x128xf32>
    %26 = tpu.matmul %23, %25, %cst_25 {dimension_numbers = #tpu.dot_dimension_numbers<[1], [0], [0], [1], [0, 0, 1, 1], [], []>} : vector<256x128xbf16>, vector<128x128xbf16>, vector<256x128xf32> -> vector<256x128xf32>
    %27 = arith.addf %20, %26 : vector<256x128xf32>
    %c0_26 = arith.constant 0 : index
    %c9 = arith.constant 9 : index
    %c0_27 = arith.constant 0 : index
    %28 = vector.load %arg9[%c0_26, %c9, %c0_27] : memref<18x32x128xf32, #tpu.memory_space<vmem>>, vector<16x16x128xf32>
    %29 = vector.shape_cast %28 : vector<16x16x128xf32> to vector<256x128xf32>
    %30 = arith.truncf %29 : vector<256x128xf32> to vector<256x128xbf16>
    %c2 = arith.constant 2 : index
    %c0_28 = arith.constant 0 : index
    %c0_29 = arith.constant 0 : index
    %31 = vector.load %arg4[%c2, %c0_28, %c0_29] : memref<9x128x128xbf16, #tpu.memory_space<vmem>>, vector<1x128x128xbf16>
    %32 = vector.shape_cast %31 : vector<1x128x128xbf16> to vector<128x128xbf16>
    %cst_30 = arith.constant dense<0.000000e+00> : vector<256x128xf32>
    %33 = tpu.matmul %30, %32, %cst_30 {dimension_numbers = #tpu.dot_dimension_numbers<[1], [0], [0], [1], [0, 0, 1, 1], [], []>} : vector<256x128xbf16>, vector<128x128xbf16>, vector<256x128xf32> -> vector<256x128xf32>
    %34 = arith.addf %27, %33 : vector<256x128xf32>
    %c1_31 = arith.constant 1 : index
    %c7_32 = arith.constant 7 : index
    %c0_33 = arith.constant 0 : index
    %35 = vector.load %arg9[%c1_31, %c7_32, %c0_33] : memref<18x32x128xf32, #tpu.memory_space<vmem>>, vector<16x16x128xf32>
    %36 = vector.shape_cast %35 : vector<16x16x128xf32> to vector<256x128xf32>
    %37 = arith.truncf %36 : vector<256x128xf32> to vector<256x128xbf16>
    %c3 = arith.constant 3 : index
    %c0_34 = arith.constant 0 : index
    %c0_35 = arith.constant 0 : index
    %38 = vector.load %arg4[%c3, %c0_34, %c0_35] : memref<9x128x128xbf16, #tpu.memory_space<vmem>>, vector<1x128x128xbf16>
    %39 = vector.shape_cast %38 : vector<1x128x128xbf16> to vector<128x128xbf16>
    %cst_36 = arith.constant dense<0.000000e+00> : vector<256x128xf32>
    %40 = tpu.matmul %37, %39, %cst_36 {dimension_numbers = #tpu.dot_dimension_numbers<[1], [0], [0], [1], [0, 0, 1, 1], [], []>} : vector<256x128xbf16>, vector<128x128xbf16>, vector<256x128xf32> -> vector<256x128xf32>
    %41 = arith.addf %34, %40 : vector<256x128xf32>
    %c1_37 = arith.constant 1 : index
    %c8_38 = arith.constant 8 : index
    %c0_39 = arith.constant 0 : index
    %42 = vector.load %arg9[%c1_37, %c8_38, %c0_39] : memref<18x32x128xf32, #tpu.memory_space<vmem>>, vector<16x16x128xf32>
    %43 = vector.shape_cast %42 : vector<16x16x128xf32> to vector<256x128xf32>
    %44 = arith.truncf %43 : vector<256x128xf32> to vector<256x128xbf16>
    %c4 = arith.constant 4 : index
    %c0_40 = arith.constant 0 : index
    %c0_41 = arith.constant 0 : index
    %45 = vector.load %arg4[%c4, %c0_40, %c0_41] : memref<9x128x128xbf16, #tpu.memory_space<vmem>>, vector<1x128x128xbf16>
    %46 = vector.shape_cast %45 : vector<1x128x128xbf16> to vector<128x128xbf16>
    %cst_42 = arith.constant dense<0.000000e+00> : vector<256x128xf32>
    %47 = tpu.matmul %44, %46, %cst_42 {dimension_numbers = #tpu.dot_dimension_numbers<[1], [0], [0], [1], [0, 0, 1, 1], [], []>} : vector<256x128xbf16>, vector<128x128xbf16>, vector<256x128xf32> -> vector<256x128xf32>
    %48 = arith.addf %41, %47 : vector<256x128xf32>
    %c1_43 = arith.constant 1 : index
    %c9_44 = arith.constant 9 : index
    %c0_45 = arith.constant 0 : index
    %49 = vector.load %arg9[%c1_43, %c9_44, %c0_45] : memref<18x32x128xf32, #tpu.memory_space<vmem>>, vector<16x16x128xf32>
    %50 = vector.shape_cast %49 : vector<16x16x128xf32> to vector<256x128xf32>
    %51 = arith.truncf %50 : vector<256x128xf32> to vector<256x128xbf16>
    %c5 = arith.constant 5 : index
    %c0_46 = arith.constant 0 : index
    %c0_47 = arith.constant 0 : index
    %52 = vector.load %arg4[%c5, %c0_46, %c0_47] : memref<9x128x128xbf16, #tpu.memory_space<vmem>>, vector<1x128x128xbf16>
    %53 = vector.shape_cast %52 : vector<1x128x128xbf16> to vector<128x128xbf16>
    %cst_48 = arith.constant dense<0.000000e+00> : vector<256x128xf32>
    %54 = tpu.matmul %51, %53, %cst_48 {dimension_numbers = #tpu.dot_dimension_numbers<[1], [0], [0], [1], [0, 0, 1, 1], [], []>} : vector<256x128xbf16>, vector<128x128xbf16>, vector<256x128xf32> -> vector<256x128xf32>
    %55 = arith.addf %48, %54 : vector<256x128xf32>
    %c2_49 = arith.constant 2 : index
    %c7_50 = arith.constant 7 : index
    %c0_51 = arith.constant 0 : index
    %56 = vector.load %arg9[%c2_49, %c7_50, %c0_51] : memref<18x32x128xf32, #tpu.memory_space<vmem>>, vector<16x16x128xf32>
    %57 = vector.shape_cast %56 : vector<16x16x128xf32> to vector<256x128xf32>
    %58 = arith.truncf %57 : vector<256x128xf32> to vector<256x128xbf16>
    %c6 = arith.constant 6 : index
    %c0_52 = arith.constant 0 : index
    %c0_53 = arith.constant 0 : index
    %59 = vector.load %arg4[%c6, %c0_52, %c0_53] : memref<9x128x128xbf16, #tpu.memory_space<vmem>>, vector<1x128x128xbf16>
    %60 = vector.shape_cast %59 : vector<1x128x128xbf16> to vector<128x128xbf16>
    %cst_54 = arith.constant dense<0.000000e+00> : vector<256x128xf32>
    %61 = tpu.matmul %58, %60, %cst_54 {dimension_numbers = #tpu.dot_dimension_numbers<[1], [0], [0], [1], [0, 0, 1, 1], [], []>} : vector<256x128xbf16>, vector<128x128xbf16>, vector<256x128xf32> -> vector<256x128xf32>
    %62 = arith.addf %55, %61 : vector<256x128xf32>
    %c2_55 = arith.constant 2 : index
    %c8_56 = arith.constant 8 : index
    %c0_57 = arith.constant 0 : index
    %63 = vector.load %arg9[%c2_55, %c8_56, %c0_57] : memref<18x32x128xf32, #tpu.memory_space<vmem>>, vector<16x16x128xf32>
    %64 = vector.shape_cast %63 : vector<16x16x128xf32> to vector<256x128xf32>
    %65 = arith.truncf %64 : vector<256x128xf32> to vector<256x128xbf16>
    %c7_58 = arith.constant 7 : index
    %c0_59 = arith.constant 0 : index
    %c0_60 = arith.constant 0 : index
    %66 = vector.load %arg4[%c7_58, %c0_59, %c0_60] : memref<9x128x128xbf16, #tpu.memory_space<vmem>>, vector<1x128x128xbf16>
    %67 = vector.shape_cast %66 : vector<1x128x128xbf16> to vector<128x128xbf16>
    %cst_61 = arith.constant dense<0.000000e+00> : vector<256x128xf32>
    %68 = tpu.matmul %65, %67, %cst_61 {dimension_numbers = #tpu.dot_dimension_numbers<[1], [0], [0], [1], [0, 0, 1, 1], [], []>} : vector<256x128xbf16>, vector<128x128xbf16>, vector<256x128xf32> -> vector<256x128xf32>
    %69 = arith.addf %62, %68 : vector<256x128xf32>
    %c2_62 = arith.constant 2 : index
    %c9_63 = arith.constant 9 : index
    %c0_64 = arith.constant 0 : index
    %70 = vector.load %arg9[%c2_62, %c9_63, %c0_64] : memref<18x32x128xf32, #tpu.memory_space<vmem>>, vector<16x16x128xf32>
    %71 = vector.shape_cast %70 : vector<16x16x128xf32> to vector<256x128xf32>
    %72 = arith.truncf %71 : vector<256x128xf32> to vector<256x128xbf16>
    %c8_65 = arith.constant 8 : index
    %c0_66 = arith.constant 0 : index
    %c0_67 = arith.constant 0 : index
    %73 = vector.load %arg4[%c8_65, %c0_66, %c0_67] : memref<9x128x128xbf16, #tpu.memory_space<vmem>>, vector<1x128x128xbf16>
    %74 = vector.shape_cast %73 : vector<1x128x128xbf16> to vector<128x128xbf16>
    %cst_68 = arith.constant dense<0.000000e+00> : vector<256x128xf32>
    %75 = tpu.matmul %72, %74, %cst_68 {dimension_numbers = #tpu.dot_dimension_numbers<[1], [0], [0], [1], [0, 0, 1, 1], [], []>} : vector<256x128xbf16>, vector<128x128xbf16>, vector<256x128xf32> -> vector<256x128xf32>
    %76 = arith.addf %69, %75 : vector<256x128xf32>
    %c0_69 = arith.constant 0 : index
    %c0_70 = arith.constant 0 : index
    %77 = vector.load %arg5[%c0_69, %c0_70] : memref<1x128xf32, #tpu.memory_space<vmem>>, vector<1x128xf32>
    %78 = vector.broadcast %77 : vector<1x128xf32> to vector<256x128xf32>
    %79 = arith.addf %76, %78 : vector<256x128xf32>
    %cst_71 = arith.constant 0.000000e+00 : f32
    %80 = vector.broadcast %cst_71 : f32 to vector<256x128xf32>
    %81 = arith.maximumf %79, %80 : vector<256x128xf32>
    %82 = arith.truncf %81 : vector<256x128xf32> to vector<256x128xbf16>
    %c0_72 = arith.constant 0 : index
    %c0_73 = arith.constant 0 : index
    %83 = vector.load %arg6[%c0_72, %c0_73] : memref<128x128xbf16, #tpu.memory_space<vmem>>, vector<128x128xbf16>
    %cst_74 = arith.constant dense<0.000000e+00> : vector<256x128xf32>
    %84 = tpu.matmul %82, %83, %cst_74 {dimension_numbers = #tpu.dot_dimension_numbers<[1], [0], [0], [1], [0, 0, 1, 1], [], []>} : vector<256x128xbf16>, vector<128x128xbf16>, vector<256x128xf32> -> vector<256x128xf32>
    %c0_75 = arith.constant 0 : index
    %c0_76 = arith.constant 0 : index
    %85 = vector.load %arg7[%c0_75, %c0_76] : memref<1x128xf32, #tpu.memory_space<vmem>>, vector<1x128xf32>
    %86 = vector.broadcast %85 : vector<1x128xf32> to vector<256x128xf32>
    %87 = arith.addf %84, %86 : vector<256x128xf32>
    %88 = arith.extf %1 : vector<256x128xbf16> to vector<256x128xf32>
    %89 = arith.addf %87, %88 : vector<256x128xf32>
    %cst_77 = arith.constant 0.000000e+00 : f32
    %90 = vector.broadcast %cst_77 : f32 to vector<256x128xf32>
    %91 = arith.maximumf %89, %90 : vector<256x128xf32>
    %92 = arith.truncf %91 : vector<256x128xf32> to vector<256x128xbf16>
    %c0_78 = arith.constant 0 : index
    %c0_79 = arith.constant 0 : index
    %c0_80 = arith.constant 0 : index
    %93 = vector.load %arg8[%c0_78, %c0_79, %c0_80] : memref<1x256x128xbf16, #tpu.memory_space<vmem>>, vector<1x256x128xbf16>
    %94 = vector.shape_cast %93 : vector<1x256x128xbf16> to vector<256x128xbf16>
    %95 = vector.shape_cast %92 : vector<256x128xbf16> to vector<1x256x128xbf16>
    tpu.vector_store %arg8[%c0_78, %c0_79, %c0_80], %95 {strides = array<i32>} : memref<1x256x128xbf16, #tpu.memory_space<vmem>>, vector<1x256x128xbf16>,
    return
  }
  func.func @transform_0(%arg0: i32) -> (i32, i32, i32) {
    %c0_i32 = arith.constant 0 : i32
    %c0_i32_0 = arith.constant 0 : i32
    %c0_i32_1 = arith.constant 0 : i32
    return %arg0, %c0_i32, %c0_i32_0 : i32, i32, i32
  }
  func.func @transform_1(%arg0: i32) -> (i32, i32) {
    %c0_i32 = arith.constant 0 : i32
    %c0_i32_0 = arith.constant 0 : i32
    %c0_i32_1 = arith.constant 0 : i32
    return %c0_i32, %c0_i32_0 : i32, i32
  }
  func.func @transform_2(%arg0: i32) -> (i32, i32) {
    %c0_i32 = arith.constant 0 : i32
    %c0_i32_0 = arith.constant 0 : i32
    %c0_i32_1 = arith.constant 0 : i32
    return %c0_i32, %c0_i32_0 : i32, i32
  }
  func.func @transform_3(%arg0: i32) -> (i32, i32, i32) {
    %c0_i32 = arith.constant 0 : i32
    %c0_i32_0 = arith.constant 0 : i32
    %c0_i32_1 = arith.constant 0 : i32
    %c0_i32_2 = arith.constant 0 : i32
    return %c0_i32, %c0_i32_0, %c0_i32_1 : i32, i32, i32
  }
  func.func @transform_4(%arg0: i32) -> (i32, i32) {
    %c0_i32 = arith.constant 0 : i32
    %c0_i32_0 = arith.constant 0 : i32
    %c0_i32_1 = arith.constant 0 : i32
    return %c0_i32, %c0_i32_0 : i32, i32
  }
  func.func @transform_5(%arg0: i32) -> (i32, i32) {
    %c0_i32 = arith.constant 0 : i32
    %c0_i32_0 = arith.constant 0 : i32
    %c0_i32_1 = arith.constant 0 : i32
    return %c0_i32, %c0_i32_0 : i32, i32
  }
  func.func @transform_6(%arg0: i32) -> (i32, i32) {
    %c0_i32 = arith.constant 0 : i32
    %c0_i32_0 = arith.constant 0 : i32
    %c0_i32_1 = arith.constant 0 : i32
    return %c0_i32, %c0_i32_0 : i32, i32
  }
  func.func @transform_7(%arg0: i32) -> (i32, i32, i32) {
    %c0_i32 = arith.constant 0 : i32
    %c0_i32_0 = arith.constant 0 : i32
    %c0_i32_1 = arith.constant 0 : i32
    return %arg0, %c0_i32, %c0_i32_0 : i32, i32, i32
  }
}

</mosaic_0001>

<bundles_post_ra>
// kernel: bottleneck_forward.1
= control target key start
LH: loop header
LB: loop body
LE: loop exit
PB: predicated region body
PF: predicated region fallthrough
CT: control target
= control target key end

     0   :  { %s5764_s24 = smov 0   ;;  %s6535_s0 = inlined_call_operand.vmem [shape: bf16[2,256,128], index: 0, kind: input, shape index: {}]   ;;  %s6536_s1 = inlined_call_operand.vmem [shape: bf16[128,128], index: 1, kind: input, shape index: {}]   ;;  %s6537_s2 = inlined_call_operand.vmem [shape: f32[1,128], index: 2, kind: input, shape index: {}]   ;;  %s6538_s3 = inlined_call_operand.vmem [shape: bf16[9,128,128], index: 3, kind: input, shape index: {}]   ;;  %s6539_s4 = inlined_call_operand.vmem [shape: f32[1,128], index: 4, kind: input, shape index: {}]   ;;  %s6540_s5 = inlined_call_operand.vmem [shape: bf16[128,128], index: 5, kind: input, shape index: {}]   ;;  %s6541_s6 = inlined_call_operand.vmem [shape: f32[1,128], index: 6, kind: input, shape index: {}]   ;;  %s6542_s7 = inlined_call_operand.vmem [shape: bf16[2,256,128], index: 7, kind: output, shape index: {}]  }
   0x1 LB: > { %s4097_s25 = sadd.s32 4294967295, %s5720_s24   ;;  %p4101_p0 = scmp.ge.s32.totalorder %s5720_s24, 1  ;;  %s5720_s24 = sphi %s5764_s24, %s17_s24  }
   0x2   : > { %p237_p1 = scmp.lt.s32.totalorder %s5720_s24, 3 }
   0x4   : > { %p238_p2 = pnand %p4101_p0, %p237_p1 }
   0x5   : > { %v5577_v0 = vld [vmem:[%s6536_s1] sm:$0xff] (!%p238_p2)   ;;  %p269_p3 = scmp.lt.s32.totalorder (!%p238_p2), %s4097_s25, 1  ;;  %v5578_v1 = vld [vmem:[%s6536_s1 + $0x8] sm:$0xff] (!%p238_p2)   ;;  %v5579_v2 = vld [vmem:[%s6536_s1 + $0x10] sm:$0xff] (!%p238_p2)   ;;  %v5722_v31 = vmov (!%p238_p2), 0.0   ;;  %v5723_v33 = vmov (!%p238_p2), 0.0|0.0  }
   0x6   : > { %241 = sbr.rel (%p238_p2) target bundleno = 1092 (0x444), region = 48  ;;  %4768 = vmatprep.subr.bf16.mxu0 (!%p238_p2), %v5577_v0  ;;  %v5580_v3 = vld [vmem:[%s6536_s1 + $0x18] sm:$0xff] (!%p238_p2)   ;;  %v5581_v5 = vld [vmem:[%s6536_s1 + $0x20] sm:$0xff] (!%p238_p2)   ;;  %v5582_v6 = vld [vmem:[%s6536_s1 + $0x28] sm:$0xff] (!%p238_p2)   ;;  %672 = vst [vmem:[#allocation2] sm:$0xff] (!%p238_p2), %v5722_v31 }
   0x7   : > { %4769 = vmatpush3.bf16.msra.mxu0 (!%p238_p2), %v5577_v0  ;;  %v5583_v7 = vld [vmem:[%s6536_s1 + $0x30] sm:$0xff] (!%p238_p2)   ;;  %v5584_v8 = vld [vmem:[%s6536_s1 + $0x38] sm:$0xff] (!%p238_p2)   ;;  %v5601_v11 = vld [vmem:[%s6538_s3 + $0x40] sm:$0xff] (!%p238_p2)   ;;  %673 = vst [vmem:[#allocation2 + $0x8] sm:$0xff] (!%p238_p2), %v5722_v31 }
   0x8   : > { %4770 = vmatprep.subr.bf16.mxu0 (!%p238_p2), %v5578_v1  ;;  %v5602_v12 = vld [vmem:[%s6538_s3 + $0x48] sm:$0xff] (!%p238_p2)   ;;  %v5603_v15 = vld [vmem:[%s6538_s3 + $0x50] sm:$0xff] (!%p238_p2)   ;;  %v5604_v16 = vld [vmem:[%s6538_s3 + $0x58] sm:$0xff] (!%p238_p2)   ;;  %674 = vst [vmem:[#allocation2 + $0x10] sm:$0xff] (!%p238_p2), %v5722_v31 }
   0x9   : > { %v5605_v28 = vld [vmem:[%s6538_s3 + $0x60] sm:$0xff] (!%p238_p2)   ;;  %v5606_v29 = vld [vmem:[%s6538_s3 + $0x68] sm:$0xff] (!%p238_p2)   ;;  %v5607_v30 = vld [vmem:[%s6538_s3 + $0x70] sm:$0xff] (!%p238_p2)   ;;  %675 = vst [vmem:[#allocation2 + $0x18] sm:$0xff] (!%p238_p2), %v5722_v31 }
   0xa   : > { %676 = vst [vmem:[#allocation2 + $0x20] sm:$0xff] (!%p238_p2), %v5722_v31  ;;  %679 = vst [vmem:[#allocation2 + $0x38] sm:$0xff] (!%p238_p2), %v5722_v31  ;;  %v5608_v32 = vld [vmem:[%s6538_s3 + $0x78] sm:$0xff] (!%p238_p2)   ;;  %v5849_v34 = vld [vmem:[%s6538_s3 + $0xc0] sm:$0xff] (!%p238_p2)  }
   0xb   : > { %4771 = vmatpush3.bf16.msra.mxu0 (!%p238_p2), %v5578_v1  ;;  %680 = vst [vmem:[#allocation2 + $0x40] sm:$0xff] (!%p238_p2), %v5722_v31  ;;  %683 = vst [vmem:[#allocation2 + $0x58] sm:$0xff] (!%p238_p2), %v5722_v31  ;;  %5296 = vmatprep.subr.bf16.mxu1 (!%p238_p2), %v5849_v34  ;;  %v5856_v35 = vld [vmem:[%s6538_s3 + $0xc8] sm:$0xff] (!%p238_p2)   ;;  %v5863_v36 = vld [vmem:[%s6538_s3 + $0xd0] sm:$0xff] (!%p238_p2)  }
   0xc   : > { %4772 = vmatprep.subr.bf16.mxu0 (!%p238_p2), %v5579_v2  ;;  %684 = vst [vmem:[#allocation2 + $0x60] sm:$0xff] (!%p238_p2), %v5722_v31  ;;  %687 = vst [vmem:[#allocation2 + $0x78] sm:$0xff] (!%p238_p2), %v5722_v31  ;;  %5304 = vmatpush3.bf16.msra.mxu1 (!%p238_p2), %v5849_v34  ;;  %v5870_v37 = vld [vmem:[%s6538_s3 + $0xd8] sm:$0xff] (!%p238_p2)   ;;  %v5877_v38 = vld [vmem:[%s6538_s3 + $0xe0] sm:$0xff] (!%p238_p2)  }
   0xd   : > { %s6544_s25 = smov (!%p269_p3, %s4097_s25), 1  ;;  %688 = vst [vmem:[#allocation2 + $0x80] sm:$0xff] %v5722_v31  ;;  %691 = vst [vmem:[#allocation2 + $0x98] sm:$0xff] %v5722_v31  ;;  %5297 = vmatprep.subr.bf16.mxu1 %v5856_v35  ;;  %v5884_v39 = vld [vmem:[%s6538_s3 + $0xe8] sm:$0xff]   ;;  %v5617_v40 = vld [vmem:[%s6538_s3] sm:$0xff]  }
   0xe   : > { %s4375_s9 = sshll.u32 %s6544_s25, 7  ;;  %692 = vst [vmem:[#allocation2 + $0xa0] sm:$0xff] %v5722_v31  ;;  %695 = vst [vmem:[#allocation2 + $0xb8] sm:$0xff] %v5722_v31  ;;  %v5894_v41 = vld [vmem:[%s6538_s3 + $0xf0] sm:$0xff]   ;;  %v5901_v42 = vld [vmem:[%s6538_s3 + $0xf8] sm:$0xff]  }
   0xf   : > { %s5789_s12 = scalar_lea.vmem %s6535_s0, %s4375_s9  ;;  %4773 = vmatpush3.bf16.msra.mxu0 %v5579_v2  ;;  %696 = vst [vmem:[#allocation2 + $0xc0] sm:$0xff] %v5722_v31  ;;  %699 = vst [vmem:[#allocation2 + $0xd8] sm:$0xff] %v5722_v31  ;;  %v5908_v43 = vld [vmem:[%s6538_s3 + $0x100] sm:$0xff]   ;;  %v5619_v60 = vld [vmem:[%s6538_s3 + $0x8] sm:$0xff]   ;;  %s6473_s20 = scalar_lea.vmem %s6542_s7, %s4375_s9 }
  0x10   : > { %v280_v4 = vld [vmem:[%s5789_s12] sm:$0xff]   ;;  %4774 = vmatprep.subr.bf16.mxu0 %v5580_v3  ;;  %v282_v9 = vld [vmem:[%s5789_s12 + $0x8] sm:$0xff]   ;;  %v284_v10 = vld [vmem:[%s5789_s12 + $0x10] sm:$0xff]   ;;  %700 = vst [vmem:[#allocation2 + $0xe0] sm:$0xff] %v5722_v31  ;;  %5305 = vmatpush3.bf16.msra.mxu1 %v5856_v35 }
  0x11   : > { %4784 = vmatprep.mubr.bf16.mxu0 %v280_v4  ;;  %v286_v13 = vld [vmem:[%s5789_s12 + $0x18] sm:$0xff]   ;;  %v288_v14 = vld [vmem:[%s5789_s12 + $0x20] sm:$0xff]   ;;  %v290_v17 = vld [vmem:[%s5789_s12 + $0x28] sm:$0xff]   ;;  %703 = vst [vmem:[#allocation2 + $0xf8] sm:$0xff] %v5722_v31  ;;  %5298 = vmatprep.subr.bf16.mxu1 %v5863_v36 }
  0x12   : > { %v292_v18 = vld [vmem:[%s5789_s12 + $0x30] sm:$0xff]   ;;  %v294_v19 = vld [vmem:[%s5789_s12 + $0x38] sm:$0xff]   ;;  %v296_v20 = vld [vmem:[%s5789_s12 + $0x40] sm:$0xff]   ;;  %704 = vst [vmem:[#allocation2 + $0x100] sm:$0xff] %v5722_v31 }
  0x13   : > { %4775 = vmatpush3.bf16.msra.mxu0 %v5580_v3  ;;  %v298_v21 = vld [vmem:[%s5789_s12 + $0x48] sm:$0xff]   ;;  %v300_v22 = vld [vmem:[%s5789_s12 + $0x50] sm:$0xff]   ;;  %v302_v23 = vld [vmem:[%s5789_s12 + $0x58] sm:$0xff]   ;;  %707 = vst [vmem:[#allocation2 + $0x118] sm:$0xff] %v5722_v31 }
  0x14   : > { %4776 = vmatprep.subr.bf16.mxu0 %v5581_v5  ;;  %v304_v24 = vld [vmem:[%s5789_s12 + $0x60] sm:$0xff]   ;;  %v306_v25 = vld [vmem:[%s5789_s12 + $0x68] sm:$0xff]   ;;  %v308_v26 = vld [vmem:[%s5789_s12 + $0x70] sm:$0xff]   ;;  %708 = vst [vmem:[#allocation2 + $0x120] sm:$0xff] %v5722_v31  ;;  %5306 = vmatpush3.bf16.msra.mxu1 %v5863_v36 }
  0x15   : > { %v310_v27 = vld [vmem:[%s5789_s12 + $0x78] sm:$0xff]   ;;  %711 = vst [vmem:[#allocation2 + $0x138] sm:$0xff] %v5722_v31  ;;  %712 = vst [vmem:[#allocation2 + $0x140] sm:$0xff] %v5722_v31  ;;  %5299 = vmatprep.subr.bf16.mxu1 %v5870_v37  ;;  %v5914_v44 = vld [vmem:[%s6537_s2] ss:$0 sm:$0xff] }
  0x16   : > { %715 = vst [vmem:[#allocation2 + $0x158] sm:$0xff] %v5722_v31  ;;  %716 = vst [vmem:[#allocation2 + $0x160] sm:$0xff] %v5722_v31 }
  0x17   : > { %4777 = vmatpush3.bf16.msra.mxu0 %v5581_v5  ;;  %719 = vst [vmem:[#allocation2 + $0x178] sm:$0xff] %v5722_v31  ;;  %720 = vst [vmem:[#allocation2 + $0x180] sm:$0xff] %v5722_v31 }
  0x18   : > { %4778 = vmatprep.subr.bf16.mxu0 %v5582_v6  ;;  %723 = vst [vmem:[#allocation2 + $0x198] sm:$0xff] %v5722_v31  ;;  %724 = vst [vmem:[#allocation2 + $0x1a0] sm:$0xff] %v5722_v31  ;;  %5307 = vmatpush3.bf16.msra.mxu1 %v5870_v37 }
  0x19   : > { %727 = vst [vmem:[#allocation2 + $0x1b8] sm:$0xff] %v5722_v31  ;;  %728 = vst [vmem:[#allocation2 + $0x1c0] sm:$0xff] %v5722_v31  ;;  %5300 = vmatprep.subr.bf16.mxu1 %v5877_v38 }
  0x1a   : > { %731 = vst [vmem:[#allocation2 + $0x1d8] sm:$0xff] %v5722_v31  ;;  %732 = vst [vmem:[#allocation2 + $0x1e0] sm:$0xff] %v5722_v31 }
  0x1b   : > { %4779 = vmatpush3.bf16.msra.mxu0 %v5582_v6  ;;  %735 = vst [vmem:[#allocation2 + $0x1f8] sm:$0xff] %v5722_v31  ;;  %736 = vst [vmem:[#allocation2 + $0x200] sm:$0xff] %v5722_v31  ;;  %v5621_v6 = vld [vmem:[%s6538_s3 + $0x10] sm:$0xff]  }
  0x1c   : > { %4780 = vmatprep.subr.bf16.mxu0 %v5583_v7  ;;  %739 = vst [vmem:[#allocation2 + $0x218] sm:$0xff] %v5722_v31  ;;  %740 = vst [vmem:[#allocation2 + $0x220] sm:$0xff] %v5722_v31  ;;  %5308 = vmatpush3.bf16.msra.mxu1 %v5877_v38 }
  0x1d   : > { %741 = vst [vmem:[#allocation2 + $0x228] sm:$0xff] %v5722_v31  ;;  %742 = vst [vmem:[#allocation2 + $0x230] sm:$0xff] %v5722_v31  ;;  %5301 = vmatprep.subr.bf16.mxu1 %v5884_v39 }
  0x1e   : > { %743 = vst [vmem:[#allocation2 + $0x238] sm:$0xff] %v5722_v31 }
  0x1f   : > { %4781 = vmatpush3.bf16.msra.mxu0 %v5583_v7 }
  0x20   : > { %4782 = vmatprep.subr.bf16.mxu0 %v5584_v8  ;;  %5309 = vmatpush3.bf16.msra.mxu1 %v5884_v39 }
  0x21   : > { %5302 = vmatprep.subr.bf16.mxu1 %v5894_v41 }
  0x23   : > { %4783 = vmatpush3.bf16.msra.mxu0 %v5584_v8 }
  0x24   : > { %4816 = vmatprep.subr.bf16.mxu0 %v5601_v11  ;;  %5310 = vmatpush3.bf16.msra.mxu1 %v5894_v41 }
  0x25   : > { %5303 = vmatprep.subr.bf16.mxu1 %v5901_v42 }
  0x26   : > { %4785 = vmatmul.mubr.bf16.vlgmr.msra.gmra.mrb[0].mxu0 %v282_v9 }
  0x27   : > { %4788 = vmatprep.mubr.bf16.mxu0 %v284_v10  ;;  %4817 = vmatpush3.bf16.msra.mxu0 %v5601_v11 }
  0x28   : > { %4818 = vmatprep.subr.bf16.mxu0 %v5602_v12  ;;  %5311 = vmatpush3.bf16.msra.mxu1 %v5901_v42 }
  0x29   : > { %5008 = vmatprep.subr.bf16.mxu1 %v5908_v43 }
  0x2b   : > { %4819 = vmatpush3.bf16.msra.mxu0 %v5602_v12  ;;  %v5623_v12 = vld [vmem:[%s6538_s3 + $0x18] sm:$0xff]  }
  0x2c   : > { %4820 = vmatprep.subr.bf16.mxu0 %v5603_v15 }
  0x2e   : > { %4789 = vmatmul.mubr.bf16.gmra.mrb[4].mxu0 %v286_v13 }
  0x2f   : > { %4792 = vmatprep.mubr.bf16.mxu0 %v288_v14  ;;  %4821 = vmatpush3.bf16.msra.mxu0 %v5603_v15 }
  0x30   : > { %4822 = vmatprep.subr.bf16.mxu0 %v5604_v16 }
  0x33   : > { %4823 = vmatpush3.bf16.msra.mxu0 %v5604_v16 }
  0x34   : > { %4824 = vmatprep.subr.bf16.mxu0 %v5605_v28 }
  0x36   : > { %4793 = vmatmul.mubr.bf16.gmra.mrb[8].mxu0 %v290_v17 }
  0x37   : > { %4796 = vmatprep.mubr.bf16.mxu0 %v292_v18  ;;  %4825 = vmatpush3.bf16.msra.mxu0 %v5605_v28  ;;  %v5627_v28 = vld [vmem:[%s6538_s3 + $0x28] sm:$0xff]  }
  0x38   : > { %4826 = vmatprep.subr.bf16.mxu0 %v5606_v29 }
  0x3b   : > { %4827 = vmatpush3.bf16.msra.mxu0 %v5606_v29 }
  0x3c   : > { %4828 = vmatprep.subr.bf16.mxu0 %v5607_v30 }
  0x3e   : > { %4797 = vmatmul.mubr.bf16.gmra.mrb[12].mxu0 %v294_v19 }
  0x3f   : > { %4800 = vmatprep.mubr.bf16.mxu0 %v296_v20  ;;  %4829 = vmatpush3.bf16.msra.mxu0 %v5607_v30 }
  0x40   : > { %4830 = vmatprep.subr.bf16.mxu0 %v5608_v32 }
  0x43   : > { %4831 = vmatpush3.bf16.msra.mxu0 %v5608_v32 }
  0x44   : > { %4864 = vmatprep.subr.bf16.mxu0 %v5617_v40 }
  0x46   : > { %4801 = vmatmul.mubr.bf16.gmra.mrb[16].mxu0 %v298_v21 }
  0x47   : > { %4804 = vmatprep.mubr.bf16.mxu0 %v300_v22  ;;  %v5625_v22 = vld [vmem:[%s6538_s3 + $0x20] sm:$0xff]  }
  0x4e   : > { %4805 = vmatmul.mubr.bf16.gmra.mrb[20].mxu0 %v302_v23 }
  0x4f   : > { %4808 = vmatprep.mubr.bf16.mxu0 %v304_v24 }
  0x56   : > { %4809 = vmatmul.mubr.bf16.gmra.mrb[24].mxu0 %v306_v25 }
  0x57   : > { %4812 = vmatprep.mubr.bf16.mxu0 %v308_v26 }
  0x5e   : > { %4813 = vmatmul.mubr.bf16.gmra.mrb[28].mxu0 %v310_v27 }
  0x5f   : > { %4832 = vmatprep.mubr.bf16.mxu0 %v5723_v33 }
  0xf9   : > { %v4786_v45 = vpop.f32.mrb[0].mxu0 }
  0xfa   : > { %v522_v46 = vadd.f32 %v4786_v45, %v5914_v44  ;;  %v513_v47 = vpop.f32.mrb[1].mxu0 }
  0xfb   : > { %v514_v48 = vadd.f32 %v5914_v44, %v513_v47  ;;  %v4787_v49 = vpop.f32.mrb[2].mxu0 }
  0xfc   : > { %v642_v50 = vmax.f32 %v522_v46, 0.0  ;;  %v525_v51 = vadd.f32 %v4787_v49, %v5914_v44  ;;  %v516_v52 = vpop.f32.mrb[3].mxu0 }
  0xfd   : > { %v640_v53 = vmax.f32 %v514_v48, 0.0  ;;  %v517_v54 = vadd.f32 %v5914_v44, %v516_v52  ;;  %v5629_v48 = vld [vmem:[%s6538_s3 + $0x30] sm:$0xff]  }
  0xfe   : > { %747 = vst [vmem:[#allocation2 + $0x48] sm:$0xff] %v642_v50  ;;  %v643_v55 = vmax.f32 %v525_v51, 0.0 }
  0xff   : > { %745 = vst [vmem:[#allocation2 + $0x28] sm:$0xff] %v640_v53  ;;  %v641_v56 = vmax.f32 %v517_v54, 0.0  ;;  %v5631_v54 = vld [vmem:[%s6538_s3 + $0x38] sm:$0xff]  }
 0x100   : > { %748 = vst [vmem:[#allocation2 + $0x50] sm:$0xff] %v643_v55  ;;  %v5920_v57 = vpack.c.bf16 %v643_v55, %v642_v50 }
 0x101   : > { %746 = vst [vmem:[#allocation2 + $0x30] sm:$0xff] %v641_v56  ;;  %v4790_v58 = vpop.f32.mrb[4].mxu0  ;;  %v5922_v59 = vpack.c.bf16 %v641_v56, %v640_v53 }
 0x102   : > { %v538_v61 = vadd.f32 %v4790_v58, %v5914_v44  ;;  %v529_v62 = vpop.f32.mrb[5].mxu0 }
 0x103   : > { %v530_v63 = vadd.f32 %v5914_v44, %v529_v62  ;;  %v4791_v0 = vpop.f32.mrb[6].mxu0  ;;  %4833 = vmatmul.mubr.bf16.vlgmr.msra.gmra.mrb[32].mxu0 %v5922_v59 }
 0x104   : > { %v646_v1 = vmax.f32 %v538_v61, 0.0  ;;  %v541_v2 = vadd.f32 %v4791_v0, %v5914_v44  ;;  %v532_v3 = vpop.f32.mrb[7].mxu0  ;;  %4836 = vmatprep.mubr.bf16.mxu0 %v5920_v57  ;;  %4865 = vmatpush3.bf16.msra.mxu0 %v5617_v40 }
 0x105   : > { %v644_v4 = vmax.f32 %v530_v63, 0.0  ;;  %v533_v5 = vadd.f32 %v5914_v44, %v532_v3  ;;  %4866 = vmatprep.subr.bf16.mxu0 %v5619_v60 }
 0x106   : > { %751 = vst [vmem:[#allocation2 + $0x88] sm:$0xff] %v646_v1  ;;  %v647_v7 = vmax.f32 %v541_v2, 0.0  ;;  %v5984_v2 = vld [vmem:[%s6538_s3 + $0x80] sm:$0xff]  }
 0x107   : > { %749 = vst [vmem:[#allocation2 + $0x68] sm:$0xff] %v644_v4  ;;  %v645_v8 = vmax.f32 %v533_v5, 0.0 }
 0x108   : > { %752 = vst [vmem:[#allocation2 + $0x90] sm:$0xff] %v647_v7  ;;  %v5936_v9 = vpack.c.bf16 %v647_v7, %v646_v1  ;;  %4867 = vmatpush3.bf16.msra.mxu0 %v5619_v60 }
 0x109   : > { %750 = vst [vmem:[#allocation2 + $0x70] sm:$0xff] %v645_v8  ;;  %v4794_v10 = vpop.f32.mrb[8].mxu0  ;;  %v5938_v11 = vpack.c.bf16 %v645_v8, %v644_v4  ;;  %4868 = vmatprep.subr.bf16.mxu0 %v5621_v6 }
 0x10a   : > { %v554_v13 = vadd.f32 %v4794_v10, %v5914_v44  ;;  %v545_v14 = vpop.f32.mrb[9].mxu0 }
 0x10b   : > { %v546_v15 = vadd.f32 %v5914_v44, %v545_v14  ;;  %v4795_v16 = vpop.f32.mrb[10].mxu0  ;;  %4837 = vmatmul.mubr.bf16.gmra.mrb[36].mxu0 %v5938_v11 }
 0x10c   : > { %v650_v17 = vmax.f32 %v554_v13, 0.0  ;;  %v557_v18 = vadd.f32 %v4795_v16, %v5914_v44  ;;  %v548_v19 = vpop.f32.mrb[11].mxu0  ;;  %4840 = vmatprep.mubr.bf16.mxu0 %v5936_v9  ;;  %4869 = vmatpush3.bf16.msra.mxu0 %v5621_v6 }
 0x10d   : > { %v648_v20 = vmax.f32 %v546_v15, 0.0  ;;  %v549_v21 = vadd.f32 %v5914_v44, %v548_v19  ;;  %4870 = vmatprep.subr.bf16.mxu0 %v5623_v12 }
 0x10e   : > { %755 = vst [vmem:[#allocation2 + $0xc8] sm:$0xff] %v650_v17  ;;  %v651_v23 = vmax.f32 %v557_v18, 0.0 }
 0x10f   : > { %753 = vst [vmem:[#allocation2 + $0xa8] sm:$0xff] %v648_v20  ;;  %v649_v24 = vmax.f32 %v549_v21, 0.0 }
 0x110   : > { %756 = vst [vmem:[#allocation2 + $0xd0] sm:$0xff] %v651_v23  ;;  %v5952_v25 = vpack.c.bf16 %v651_v23, %v650_v17  ;;  %4871 = vmatpush3.bf16.msra.mxu0 %v5623_v12 }
 0x111   : > { %754 = vst [vmem:[#allocation2 + $0xb0] sm:$0xff] %v649_v24  ;;  %v4798_v26 = vpop.f32.mrb[12].mxu0  ;;  %v5954_v27 = vpack.c.bf16 %v649_v24, %v648_v20  ;;  %4872 = vmatprep.subr.bf16.mxu0 %v5625_v22 }
 0x112   : > { %v570_v29 = vadd.f32 %v4798_v26, %v5914_v44  ;;  %v561_v30 = vpop.f32.mrb[13].mxu0 }
 0x113   : > { %v562_v31 = vadd.f32 %v5914_v44, %v561_v30  ;;  %v4799_v32 = vpop.f32.mrb[14].mxu0  ;;  %4841 = vmatmul.mubr.bf16.gmra.mrb[40].mxu0 %v5954_v27 }
 0x114   : > { %v654_v33 = vmax.f32 %v570_v29, 0.0  ;;  %v573_v40 = vadd.f32 %v4799_v32, %v5914_v44  ;;  %v564_v45 = vpop.f32.mrb[15].mxu0  ;;  %4844 = vmatprep.mubr.bf16.mxu0 %v5952_v25  ;;  %4873 = vmatpush3.bf16.msra.mxu0 %v5625_v22 }
 0x115   : > { %v652_v46 = vmax.f32 %v562_v31, 0.0  ;;  %v565_v47 = vadd.f32 %v5914_v44, %v564_v45  ;;  %4874 = vmatprep.subr.bf16.mxu0 %v5627_v28 }
 0x116   : > { %759 = vst [vmem:[#allocation2 + $0x108] sm:$0xff] %v654_v33  ;;  %v655_v49 = vmax.f32 %v573_v40, 0.0  ;;  %v5620_v40 = vld [vmem:[%s6538_s3 + $0x108] sm:$0xff]  }
 0x117   : > { %757 = vst [vmem:[#allocation2 + $0xe8] sm:$0xff] %v652_v46  ;;  %v653_v50 = vmax.f32 %v565_v47, 0.0 }
 0x118   : > { %760 = vst [vmem:[#allocation2 + $0x110] sm:$0xff] %v655_v49  ;;  %v5968_v51 = vpack.c.bf16 %v655_v49, %v654_v33  ;;  %4875 = vmatpush3.bf16.msra.mxu0 %v5627_v28 }
 0x119   : > { %758 = vst [vmem:[#allocation2 + $0xf0] sm:$0xff] %v653_v50  ;;  %v4802_v52 = vpop.f32.mrb[16].mxu0  ;;  %v5970_v53 = vpack.c.bf16 %v653_v50, %v652_v46  ;;  %4876 = vmatprep.subr.bf16.mxu0 %v5629_v48 }
 0x11a   : > { %v586_v55 = vadd.f32 %v4802_v52, %v5914_v44  ;;  %v577_v56 = vpop.f32.mrb[17].mxu0 }
 0x11b   : > { %v578_v58 = vadd.f32 %v5914_v44, %v577_v56  ;;  %v4803_v60 = vpop.f32.mrb[18].mxu0  ;;  %4845 = vmatmul.mubr.bf16.gmra.mrb[44].mxu0 %v5970_v53 }
 0x11c   : > { %v658_v61 = vmax.f32 %v586_v55, 0.0  ;;  %v589_v62 = vadd.f32 %v4803_v60, %v5914_v44  ;;  %v580_v63 = vpop.f32.mrb[19].mxu0  ;;  %4848 = vmatprep.mubr.bf16.mxu0 %v5968_v51  ;;  %4877 = vmatpush3.bf16.msra.mxu0 %v5629_v48  ;;  %v5622_v55 = vld [vmem:[%s6538_s3 + $0x110] sm:$0xff]  }
 0x11d   : > { %v656_v0 = vmax.f32 %v578_v58, 0.0  ;;  %v581_v1 = vadd.f32 %v5914_v44, %v580_v63  ;;  %4878 = vmatprep.subr.bf16.mxu0 %v5631_v54 }
 0x11e   : > { %763 = vst [vmem:[#allocation2 + $0x148] sm:$0xff] %v658_v61  ;;  %v659_v3 = vmax.f32 %v589_v62, 0.0 }
 0x11f   : > { %761 = vst [vmem:[#allocation2 + $0x128] sm:$0xff] %v656_v0  ;;  %v657_v4 = vmax.f32 %v581_v1, 0.0 }
 0x120   : > { %764 = vst [vmem:[#allocation2 + $0x150] sm:$0xff] %v659_v3  ;;  %v5986_v5 = vpack.c.bf16 %v659_v3, %v658_v61  ;;  %4879 = vmatpush3.bf16.msra.mxu0 %v5631_v54 }
 0x121   : > { %762 = vst [vmem:[#allocation2 + $0x130] sm:$0xff] %v657_v4  ;;  %v4806_v6 = vpop.f32.mrb[20].mxu0  ;;  %v5988_v7 = vpack.c.bf16 %v657_v4, %v656_v0  ;;  %4912 = vmatprep.subr.bf16.mxu0 %v5984_v2 }
 0x122   : > { %v602_v8 = vadd.f32 %v4806_v6, %v5914_v44  ;;  %v593_v10 = vpop.f32.mrb[21].mxu0 }
 0x123   : > { %v594_v12 = vadd.f32 %v5914_v44, %v593_v10  ;;  %v4807_v13 = vpop.f32.mrb[22].mxu0  ;;  %4849 = vmatmul.mubr.bf16.gmra.mrb[48].mxu0 %v5988_v7 }
 0x124   : > { %v662_v14 = vmax.f32 %v602_v8, 0.0  ;;  %v605_v15 = vadd.f32 %v4807_v13, %v5914_v44  ;;  %v596_v16 = vpop.f32.mrb[23].mxu0  ;;  %4852 = vmatprep.mubr.bf16.mxu0 %v5986_v5  ;;  %v5624_v8 = vld [vmem:[%s6538_s3 + $0x118] sm:$0xff]  }
 0x125   : > { %v660_v17 = vmax.f32 %v594_v12, 0.0  ;;  %v597_v18 = vadd.f32 %v5914_v44, %v596_v16  ;;  %v1648_v29 = vld [vmem:[#allocation2 + $0x147] sm:$0xff] }
 0x126   : > { %767 = vst [vmem:[#allocation2 + $0x188] sm:$0xff] %v662_v14  ;;  %v663_v19 = vmax.f32 %v605_v15, 0.0  ;;  %v1646_v22 = vld [vmem:[#allocation2 + $0x127] sm:$0xff] }
 0x127   : > { %765 = vst [vmem:[#allocation2 + $0x168] sm:$0xff] %v660_v17  ;;  %v661_v20 = vmax.f32 %v597_v18, 0.0  ;;  %v1649_v21 = vld [vmem:[#allocation2 + $0x14f] sm:$0xff]  ;;  %v777_v18 = vld [vmem:[#allocation2 + $0x7] sm:$0xff] }
 0x128   : > { %768 = vst [vmem:[#allocation2 + $0x190] sm:$0xff] %v663_v19  ;;  %v1647_v23 = vld [vmem:[#allocation2 + $0x12f] sm:$0xff]  ;;  %v5997_v24 = vpack.c.bf16 %v663_v19, %v662_v14  ;;  %v6004_v33 = vpack.c.bf16 %v1649_v21, %v1648_v29  ;;  %v5626_v21 = vld [vmem:[%s6538_s3 + $0x120] sm:$0xff]  }
 0x129   : > { %766 = vst [vmem:[#allocation2 + $0x170] sm:$0xff] %v661_v20  ;;  %v4810_v26 = vpop.f32.mrb[24].mxu0  ;;  %v5999_v28 = vpack.c.bf16 %v1647_v23, %v1646_v22  ;;  %v6001_v30 = vpack.c.bf16 %v661_v20, %v660_v17  ;;  %v778_v19 = vld [vmem:[#allocation2 + $0xf] sm:$0xff] }
 0x12a   : > { %v618_v31 = vadd.f32 %v4810_v26, %v5914_v44  ;;  %v609_v32 = vpop.f32.mrb[25].mxu0 }
 0x12b   : > { %v610_v45 = vadd.f32 %v5914_v44, %v609_v32  ;;  %v4811_v46 = vpop.f32.mrb[26].mxu0  ;;  %4992 = vmatprep.mubr.bf16.mxu1 %v5999_v28  ;;  %4853 = vmatmul.mubr.bf16.gmra.mrb[52].mxu0 %v6001_v30 }
 0x12c   : > { %v666_v47 = vmax.f32 %v618_v31, 0.0  ;;  %v621_v48 = vadd.f32 %v4811_v46, %v5914_v44  ;;  %v612_v49 = vpop.f32.mrb[27].mxu0  ;;  %4993 = vmatmul.mubr.bf16.vlgmr.msra.gmra.mrb[0].mxu1 %v6004_v33  ;;  %4856 = vmatprep.mubr.bf16.mxu0 %v5997_v24  ;;  %v809_v31 = vpack.c.bf16 %v778_v19, %v777_v18  ;;  %v788_v19 = vld [vmem:[#allocation2 + $0xaf] sm:$0xff] }
 0x12d   : > { %v664_v50 = vmax.f32 %v610_v45, 0.0  ;;  %v613_v52 = vadd.f32 %v5914_v44, %v612_v49  ;;  %5009 = vmatpush3.bf16.msra.mxu1 %v5908_v43  ;;  %v1652_v43 = vld [vmem:[#allocation2 + $0x187] sm:$0xff]  ;;  %v780_v49 = vld [vmem:[#allocation2 + $0x2f] sm:$0xff] }
 0x12e   : > { %771 = vst [vmem:[#allocation2 + $0x1c8] sm:$0xff] %v666_v47  ;;  %v667_v54 = vmax.f32 %v621_v48, 0.0  ;;  %5010 = vmatprep.subr.bf16.mxu1 %v5620_v40  ;;  %v1650_v60 = vld [vmem:[#allocation2 + $0x167] sm:$0xff]  ;;  %v5630_v48 = vld [vmem:[%s6538_s3 + $0x130] sm:$0xff]  }
 0x12f   : > { %769 = vst [vmem:[#allocation2 + $0x1a8] sm:$0xff] %v664_v50  ;;  %v665_v56 = vmax.f32 %v613_v52, 0.0  ;;  %v1653_v58 = vld [vmem:[#allocation2 + $0x18f] sm:$0xff] }
 0x130   : > { %772 = vst [vmem:[#allocation2 + $0x1d0] sm:$0xff] %v667_v54  ;;  %v1651_v61 = vld [vmem:[#allocation2 + $0x16f] sm:$0xff]  ;;  %v6020_v62 = vpack.c.bf16 %v667_v54, %v666_v47  ;;  %v6027_v6 = vpack.c.bf16 %v1653_v58, %v1652_v43 }
 0x131   : > { %770 = vst [vmem:[#allocation2 + $0x1b0] sm:$0xff] %v665_v56  ;;  %5011 = vmatpush3.bf16.msra.mxu1 %v5620_v40  ;;  %v4814_v63 = vpop.f32.mrb[28].mxu0  ;;  %v6022_v0 = vpack.c.bf16 %v1651_v61, %v1650_v60  ;;  %v6024_v1 = vpack.c.bf16 %v665_v56, %v664_v50  ;;  %v5628_v47 = vld [vmem:[%s6538_s3 + $0x128] sm:$0xff]  }
 0x132   : > { %v634_v3 = vadd.f32 %v4814_v63, %v5914_v44  ;;  %v625_v4 = vpop.f32.mrb[29].mxu0  ;;  %5012 = vmatprep.subr.bf16.mxu1 %v5622_v55  ;;  %v782_v52 = vld [vmem:[#allocation2 + $0x4f] sm:$0xff]  ;;  %v779_v56 = vld [vmem:[#allocation2 + $0x27] sm:$0xff] }
 0x133   : > { %v626_v10 = vadd.f32 %v5914_v44, %v625_v4  ;;  %v4815_v12 = vpop.f32.mrb[30].mxu0  ;;  %4996 = vmatprep.mubr.bf16.mxu1 %v6022_v0  ;;  %4857 = vmatmul.mubr.bf16.gmra.mrb[56].mxu0 %v6024_v1  ;;  %v6061_v61 = vpack.c.bf16 %v780_v49, %v779_v56  ;;  %v781_v63 = vld [vmem:[#allocation2 + $0x47] sm:$0xff]  ;;  %v5646_v49 = vld [vmem:[%s6538_s3 + $0xb0] sm:$0xff]  }
 0x134   : > { %v670_v13 = vmax.f32 %v634_v3, 0.0  ;;  %v637_v14 = vadd.f32 %v4815_v12, %v5914_v44  ;;  %v628_v15 = vpop.f32.mrb[31].mxu0  ;;  %4997 = vmatmul.mubr.bf16.gmra.mrb[4].mxu1 %v6027_v6  ;;  %4860 = vmatprep.mubr.bf16.mxu0 %v6020_v62  ;;  %v5632_v3 = vld [vmem:[%s6538_s3 + $0x138] sm:$0xff]   ;;  %v6066_v4 = vpack.c.bf16 %v782_v52, %v781_v63  ;;  %v784_v12 = vld [vmem:[#allocation2 + $0x6f] sm:$0xff]  ;;  %v793_v52 = vld [vmem:[#allocation2 + $0x107] sm:$0xff] }
 0x135   : > { %v668_v16 = vmax.f32 %v626_v10, 0.0  ;;  %v629_v17 = vadd.f32 %v5914_v44, %v628_v15  ;;  %5013 = vmatpush3.bf16.msra.mxu1 %v5622_v55  ;;  %v1656_v40 = vld [vmem:[#allocation2 + $0x1c7] sm:$0xff]  ;;  %v5644_v56 = vld [vmem:[%s6538_s3 + $0x170] sm:$0xff]  }
 0x136   : > { %775 = vst [vmem:[#allocation2 + $0x208] sm:$0xff] %v670_v13  ;;  %v671_v20 = vmax.f32 %v637_v14, 0.0  ;;  %5014 = vmatprep.subr.bf16.mxu1 %v5624_v8  ;;  %v1654_v26 = vld [vmem:[#allocation2 + $0x1a7] sm:$0xff]  ;;  %v5640_v14 = vld [vmem:[%s6538_s3 + $0x90] sm:$0xff]  }
 0x137   : > { %773 = vst [vmem:[#allocation2 + $0x1e8] sm:$0xff] %v668_v16  ;;  %v669_v22 = vmax.f32 %v629_v17, 0.0  ;;  %v1657_v23 = vld [vmem:[#allocation2 + $0x1cf] sm:$0xff]  ;;  %v5633_v10 = vld [vmem:[%s6538_s3 + $0x140] sm:$0xff]  }
 0x138   : > { %776 = vst [vmem:[#allocation2 + $0x210] sm:$0xff] %v671_v20  ;;  %v1655_v29 = vld [vmem:[#allocation2 + $0x1af] sm:$0xff]  ;;  %v6042_v32 = vpack.c.bf16 %v671_v20, %v670_v13  ;;  %v6048_v46 = vpack.c.bf16 %v1657_v23, %v1656_v40  ;;  %v783_v15 = vld [vmem:[#allocation2 + $0x67] sm:$0xff] }
 0x139   : > { %774 = vst [vmem:[#allocation2 + $0x1f0] sm:$0xff] %v669_v22  ;;  %5015 = vmatpush3.bf16.msra.mxu1 %v5624_v8  ;;  %v6044_v44 = vpack.c.bf16 %v1655_v29, %v1654_v26  ;;  %v6046_v45 = vpack.c.bf16 %v669_v22, %v668_v16  ;;  %v5639_v8 = vld [vmem:[%s6538_s3 + $0x88] sm:$0xff]   ;;  %v6082_v16 = vpack.c.bf16 %v784_v12, %v783_v15  ;;  %v5635_v20 = vld [vmem:[%s6538_s3 + $0x150] sm:$0xff]   ;;  %v5643_v22 = vld [vmem:[%s6538_s3 + $0xa0] sm:$0xff]  }
 0x13a   : > { %5016 = vmatprep.subr.bf16.mxu1 %v5626_v21  ;;  %v786_v13 = vld [vmem:[#allocation2 + $0x8f] sm:$0xff]  ;;  %v785_v17 = vld [vmem:[#allocation2 + $0x87] sm:$0xff]  ;;  %v5636_v29 = vld [vmem:[%s6538_s3 + $0x158] sm:$0xff]  }
 0x13b   : > { %5000 = vmatprep.mubr.bf16.mxu1 %v6044_v44  ;;  %4861 = vmatmul.mubr.bf16.gmra.mrb[60].mxu0 %v6046_v45  ;;  %v6087_v18 = vpack.c.bf16 %v786_v13, %v785_v17  ;;  %v787_v23 = vld [vmem:[#allocation2 + $0xa7] sm:$0xff]  ;;  %v792_v40 = vld [vmem:[#allocation2 + $0xef] sm:$0xff] }
 0x13c   : > { %5001 = vmatmul.mubr.bf16.gmra.mrb[8].mxu1 %v6048_v46  ;;  %4880 = vmatprep.mubr.bf16.mxu0 %v809_v31  ;;  %v789_v26 = vld [vmem:[#allocation2 + $0xc7] sm:$0xff]  ;;  %v2255_v12 = vld [vmem:[#allocation2 + $0xf1] sm:$0xff] }
 0x13d   : > { %5017 = vmatpush3.bf16.msra.mxu1 %v5626_v21  ;;  %v1660_v60 = vld [vmem:[#allocation2 + $0x207] sm:$0xff]  ;;  %v790_v21 = vld [vmem:[#allocation2 + $0xcf] sm:$0xff] }
 0x13e   : > { %5018 = vmatprep.subr.bf16.mxu1 %v5628_v47  ;;  %v1658_v54 = vld [vmem:[#allocation2 + $0x1e7] sm:$0xff] }
 0x13f   : > { %v1661_v50 = vld [vmem:[#allocation2 + $0x20f] sm:$0xff]  ;;  %v5653_v13 = vld [vmem:[%s6538_s3 + $0x1a0] sm:$0xff]  }
 0x140   : > { %v1659_v55 = vld [vmem:[#allocation2 + $0x1ef] sm:$0xff]  ;;  %v1677_v43 = vpack.c.bf16 %v1661_v50, %v1660_v60  ;;  %v791_v50 = vld [vmem:[#allocation2 + $0xe7] sm:$0xff]  ;;  %v5647_v60 = vld [vmem:[%s6538_s3 + $0x178] sm:$0xff]  }
 0x141   : > { %5019 = vmatpush3.bf16.msra.mxu1 %v5628_v47  ;;  %v6059_v58 = vpack.c.bf16 %v1659_v55, %v1658_v54  ;;  %v5645_v31 = vld [vmem:[%s6538_s3 + $0xa8] sm:$0xff]   ;;  %v5638_v47 = vld [vmem:[%s6538_s3 + $0x160] sm:$0xff]   ;;  %v5648_v55 = vld [vmem:[%s6538_s3 + $0xb8] sm:$0xff]  }
 0x142   : > { %5020 = vmatprep.subr.bf16.mxu1 %v5630_v48  ;;  %v5641_v54 = vld [vmem:[%s6538_s3 + $0x168] sm:$0xff]  }
 0x143   : > { %5004 = vmatprep.mubr.bf16.mxu1 %v6059_v58  ;;  %4881 = vmatmul.mubr.bf16.vlgmr.msra.gmra.mrb[32].mxu0 %v6061_v61  ;;  %v1336_v63 = vld [vmem:[#allocation2 + $0xc9] sm:$0xff] }
 0x144   : > { %5005 = vmatmul.mubr.bf16.gmra.mrb[12].mxu1 %v1677_v43  ;;  %4884 = vmatprep.mubr.bf16.mxu0 %v6066_v4  ;;  %v1337_v43 = vld [vmem:[#allocation2 + $0xd1] sm:$0xff] }
 0x145   : > { %5021 = vmatpush3.bf16.msra.mxu1 %v5630_v48  ;;  %5024 = vmatprep.mubr.bf16.mxu1 %v5922_v59  ;;  %v5634_v59 = vld [vmem:[%s6538_s3 + $0x148] sm:$0xff]  }
 0x146   : > { %5022 = vmatprep.subr.bf16.mxu1 %v5632_v3  ;;  %4913 = vmatpush3.bf16.msra.mxu0 %v5984_v2  ;;  %v5642_v2 = vld [vmem:[%s6538_s3 + $0x98] sm:$0xff]   ;;  %v794_v48 = vld [vmem:[#allocation2 + $0x10f] sm:$0xff] }
 0x147   : > { %4914 = vmatprep.subr.bf16.mxu0 %v5639_v8 }
 0x149   : > { %5023 = vmatpush3.bf16.msra.mxu1 %v5632_v3 }
 0x14a   : > { %5056 = vmatprep.subr.bf16.mxu1 %v5633_v10  ;;  %4915 = vmatpush3.bf16.msra.mxu0 %v5639_v8  ;;  %v6187_v8 = vpack.c.bf16 %v1337_v43, %v1336_v63  ;;  %v2574_v63 = vld [vmem:[#allocation2 + $0x1cf] sm:$0xff]  ;;  %v2571_v43 = vld [vmem:[#allocation2 + $0x1a7] sm:$0xff] }
 0x14b   : > { %4885 = vmatmul.mubr.bf16.gmra.mrb[36].mxu0 %v6082_v16  ;;  %4916 = vmatprep.subr.bf16.mxu0 %v5640_v14 }
 0x14c   : > { %5025 = vmatmul.mubr.bf16.vlgmr.msra.gmra.mrb[16].mxu1 %v5920_v57  ;;  %4888 = vmatprep.mubr.bf16.mxu0 %v6087_v18  ;;  %v6102_v57 = vpack.c.bf16 %v788_v19, %v787_v23  ;;  %v5655_v19 = vld [vmem:[%s6538_s3 + $0x1b0] sm:$0xff]   ;;  %v5656_v23 = vld [vmem:[%s6538_s3 + $0x1b8] sm:$0xff]  }
 0x14d   : > { %5057 = vmatpush3.bf16.msra.mxu1 %v5633_v10  ;;  %5028 = vmatprep.mubr.bf16.mxu1 %v5938_v11  ;;  %v6104_v11 = vpack.c.bf16 %v790_v21, %v789_v26  ;;  %v5652_v10 = vld [vmem:[%s6538_s3 + $0x198] sm:$0xff]  }
 0x14e   : > { %5058 = vmatprep.subr.bf16.mxu1 %v5634_v59  ;;  %4917 = vmatpush3.bf16.msra.mxu0 %v5640_v14  ;;  %v1341_v14 = vld [vmem:[#allocation2 + $0x111] sm:$0xff] }
 0x14f   : > { %4918 = vmatprep.subr.bf16.mxu0 %v5642_v2  ;;  %v2263_v26 = vld [vmem:[#allocation2 + $0x171] sm:$0xff] }
 0x151   : > { %5059 = vmatpush3.bf16.msra.mxu1 %v5634_v59  ;;  %v5654_v59 = vld [vmem:[%s6538_s3 + $0x1a8] sm:$0xff]  }
 0x152   : > { %5060 = vmatprep.subr.bf16.mxu1 %v5635_v20  ;;  %4919 = vmatpush3.bf16.msra.mxu0 %v5642_v2  ;;  %v2259_v2 = vld [vmem:[#allocation2 + $0x131] sm:$0xff] }
 0x153   : > { %4889 = vmatmul.mubr.bf16.gmra.mrb[40].mxu0 %v6102_v57  ;;  %4920 = vmatprep.subr.bf16.mxu0 %v5643_v22 }
 0x154   : > { %5029 = vmatmul.mubr.bf16.gmra.mrb[20].mxu1 %v5936_v9  ;;  %4892 = vmatprep.mubr.bf16.mxu0 %v6104_v11  ;;  %v6122_v9 = vpack.c.bf16 %v792_v40, %v791_v50  ;;  %v1349_v40 = vld [vmem:[#allocation2 + $0x191] sm:$0xff]  ;;  %v1352_v50 = vld [vmem:[#allocation2 + $0x1c9] sm:$0xff] }
 0x155   : > { %5032 = vmatprep.mubr.bf16.mxu1 %v5954_v27  ;;  %5061 = vmatpush3.bf16.msra.mxu1 %v5635_v20  ;;  %v6124_v27 = vpack.c.bf16 %v794_v48, %v793_v52  ;;  %v1345_v20 = vld [vmem:[#allocation2 + $0x151] sm:$0xff]  ;;  %v2266_v48 = vld [vmem:[#allocation2 + $0x1a9] sm:$0xff] }
 0x156   : > { %5062 = vmatprep.subr.bf16.mxu1 %v5636_v29  ;;  %4921 = vmatpush3.bf16.msra.mxu0 %v5643_v22  ;;  %v1353_v52 = vld [vmem:[#allocation2 + $0x1d1] sm:$0xff] }
 0x157   : > { %4922 = vmatprep.subr.bf16.mxu0 %v5645_v31 }
 0x159   : > { %5063 = vmatpush3.bf16.msra.mxu1 %v5636_v29  ;;  %v5657_v29 = vld [vmem:[%s6538_s3 + $0x1c0] sm:$0xff]  }
 0x15a   : > { %5064 = vmatprep.subr.bf16.mxu1 %v5638_v47  ;;  %4923 = vmatpush3.bf16.msra.mxu0 %v5645_v31  ;;  %v1348_v31 = vld [vmem:[#allocation2 + $0x189] sm:$0xff] }
 0x15b   : > { %4893 = vmatmul.mubr.bf16.gmra.mrb[44].mxu0 %v6122_v9  ;;  %4924 = vmatprep.subr.bf16.mxu0 %v5646_v49 }
 0x15c   : > { %5033 = vmatmul.mubr.bf16.gmra.mrb[24].mxu1 %v5952_v25  ;;  %4896 = vmatprep.mubr.bf16.mxu0 %v6124_v27  ;;  %v5649_v25 = vld [vmem:[%s6538_s3 + $0x180] sm:$0xff]  }
 0x15d   : > { %5036 = vmatprep.mubr.bf16.mxu1 %v5970_v53  ;;  %5065 = vmatpush3.bf16.msra.mxu1 %v5638_v47  ;;  %v1325_v53 = vld [vmem:[#allocation2 + $0x11] sm:$0xff] }
 0x15e   : > { %5066 = vmatprep.subr.bf16.mxu1 %v5641_v54  ;;  %4925 = vmatpush3.bf16.msra.mxu0 %v5646_v49  ;;  %v2267_v49 = vld [vmem:[#allocation2 + $0x1b1] sm:$0xff] }
 0x15f   : > { %4926 = vmatprep.subr.bf16.mxu0 %v5648_v55 }
 0x161   : > { %5067 = vmatpush3.bf16.msra.mxu1 %v5641_v54  ;;  %v6244_v54 = vpack.c.bf16 %v2267_v49, %v2266_v48  ;;  %v2859_v49 = vld [vmem:[#allocation2 + $0x88] sm:$0xff] }
 0x162   : > { %5068 = vmatprep.subr.bf16.mxu1 %v5644_v56  ;;  %4927 = vmatpush3.bf16.msra.mxu0 %v5648_v55  ;;  %v6246_v55 = vpack.c.bf16 %v1353_v52, %v1352_v50  ;;  %v5666_v50 = vld [vmem:[%s6538_s3 + $0x208] sm:$0xff]  }
 0x163   : > { %4897 = vmatmul.mubr.bf16.gmra.mrb[48].mxu0 %v5999_v28  ;;  %4960 = vmatprep.subr.bf16.mxu0 %v5849_v34  ;;  %v2243_v28 = vld [vmem:[#allocation2 + $0x31] sm:$0xff] }
 0x164   : > { %5037 = vmatmul.mubr.bf16.gmra.mrb[28].mxu1 %v5968_v51  ;;  %4900 = vmatprep.mubr.bf16.mxu0 %v6004_v33  ;;  %v1324_v51 = vld [vmem:[#allocation2 + $0x9] sm:$0xff]  ;;  %v1329_v33 = vld [vmem:[#allocation2 + $0x51] sm:$0xff] }
 0x165   : > { %5040 = vmatprep.mubr.bf16.mxu1 %v5988_v7  ;;  %5069 = vmatpush3.bf16.msra.mxu1 %v5644_v56  ;;  %v1356_v7 = vpack.c.bf16 %v1325_v53, %v1324_v51  ;;  %v2270_v56 = vld [vmem:[#allocation2 + $0x1e9] sm:$0xff]  ;;  %v2273_v53 = vld [vmem:[#allocation2 + $0x211] sm:$0xff] }
 0x166   : > { %5070 = vmatprep.subr.bf16.mxu1 %v5647_v60  ;;  %v2272_v51 = vld [vmem:[#allocation2 + $0x209] sm:$0xff] }
 0x169   : > { %5071 = vmatpush3.bf16.msra.mxu1 %v5647_v60  ;;  %v2271_v60 = vld [vmem:[#allocation2 + $0x1f1] sm:$0xff] }
 0x16a   : > { %5104 = vmatprep.subr.bf16.mxu1 %v5649_v25 }
 0x16b   : > { %4901 = vmatmul.mubr.bf16.gmra.mrb[52].mxu0 %v6022_v0 }
 0x16c   : > { %5041 = vmatmul.mubr.bf16.gmra.mrb[0].mxu1 %v5986_v5  ;;  %4904 = vmatprep.mubr.bf16.mxu0 %v6027_v6  ;;  %v2242_v5 = vld [vmem:[#allocation2 + $0x29] sm:$0xff] }
 0x16d   : > { %5044 = vmatprep.mubr.bf16.mxu1 %v6001_v30  ;;  %v1328_v30 = vld [vmem:[#allocation2 + $0x49] sm:$0xff]  ;;  %v2274_v0 = vpack.c.bf16 %v2243_v28, %v2242_v5 }
 0x16e   : > { %v1332_v6 = vld [vmem:[#allocation2 + $0x89] sm:$0xff] }
 0x16f   : > { %v5658_v5 = vld [vmem:[%s6538_s3 + $0x1c8] sm:$0xff]  }
 0x170   : > { %v2566_v28 = vld [vmem:[#allocation2 + $0x14f] sm:$0xff] }
 0x173   : > { %4905 = vmatmul.mubr.bf16.gmra.mrb[56].mxu0 %v6044_v44  ;;  %v1333_v44 = vld [vmem:[#allocation2 + $0x91] sm:$0xff] }
 0x174   : > { %5045 = vmatmul.mubr.bf16.gmra.mrb[4].mxu1 %v5997_v24  ;;  %4908 = vmatprep.mubr.bf16.mxu0 %v6048_v46  ;;  %v6161_v24 = vpack.c.bf16 %v1329_v33, %v1328_v30  ;;  %v5650_v46 = vld [vmem:[%s6538_s3 + $0x188] sm:$0xff]  }
 0x175   : > { %5048 = vmatprep.mubr.bf16.mxu1 %v6024_v1  ;;  %v2246_v1 = vld [vmem:[#allocation2 + $0x69] sm:$0xff] }
 0x176   : > { %v2563_v30 = vld [vmem:[#allocation2 + $0x127] sm:$0xff] }
 0x17b   : > { %4909 = vmatmul.mubr.bf16.gmra.mrb[60].mxu0 %v6059_v58  ;;  %v5651_v58 = vld [vmem:[%s6538_s3 + $0x190] sm:$0xff]  }
 0x17c   : > { %5049 = vmatmul.mubr.bf16.gmra.mrb[8].mxu1 %v6020_v62  ;;  %4928 = vmatprep.mubr.bf16.mxu0 %v1356_v7  ;;  %v2247_v62 = vld [vmem:[#allocation2 + $0x71] sm:$0xff]  ;;  %v6258_v7 = vpack.c.bf16 %v2273_v53, %v2272_v51  ;;  %v2861_v53 = vld [vmem:[#allocation2 + $0xa8] sm:$0xff] }
 0x17d   : > { %5052 = vmatprep.mubr.bf16.mxu1 %v6046_v45  ;;  %v6167_v45 = vpack.c.bf16 %v2247_v62, %v2246_v1  ;;  %v5664_v1 = vld [vmem:[%s6538_s3 + $0x1f8] sm:$0xff]   ;;  %v2568_v62 = vld [vmem:[#allocation2 + $0x16f] sm:$0xff] }
 0x17e   : > { %v2864_v51 = vld [vmem:[#allocation2 + $0xd0] sm:$0xff] }
 0x183   : > { %4929 = vmatmul.mubr.bf16.vlgmr.msra.gmra.mrb[32].mxu0 %v2274_v0 }
 0x184   : > { %5053 = vmatmul.mubr.bf16.gmra.mrb[12].mxu1 %v6042_v32  ;;  %4932 = vmatprep.mubr.bf16.mxu0 %v6161_v24  ;;  %v6173_v32 = vpack.c.bf16 %v1333_v44, %v1332_v6  ;;  %v2570_v6 = vld [vmem:[#allocation2 + $0x18f] sm:$0xff]  ;;  %v2567_v44 = vld [vmem:[#allocation2 + $0x167] sm:$0xff] }
 0x185   : > { %5072 = vmatprep.mubr.bf16.mxu1 %v2274_v0  ;;  %4961 = vmatpush3.bf16.msra.mxu0 %v5849_v34  ;;  %v2250_v34 = vld [vmem:[#allocation2 + $0xa9] sm:$0xff] }
 0x186   : > { %4962 = vmatprep.subr.bf16.mxu0 %v5856_v35  ;;  %v2565_v0 = vld [vmem:[#allocation2 + $0x147] sm:$0xff] }
 0x189   : > { %4963 = vmatpush3.bf16.msra.mxu0 %v5856_v35  ;;  %v2251_v35 = vld [vmem:[#allocation2 + $0xb1] sm:$0xff] }
 0x18a   : > { %4964 = vmatprep.subr.bf16.mxu0 %v5863_v36  ;;  %v6185_v3 = vpack.c.bf16 %v2251_v35, %v2250_v34  ;;  %v2569_v34 = vld [vmem:[#allocation2 + $0x187] sm:$0xff] }
 0x18b   : > { %4933 = vmatmul.mubr.bf16.gmra.mrb[36].mxu0 %v6167_v45  ;;  %v2591_v35 = vpack.c.bf16 %v2570_v6, %v2569_v34  ;;  %v2869_v6 = vld [vmem:[#allocation2 + $0x128] sm:$0xff]  ;;  %v5672_v34 = vld [vmem:[%s6538_s3 + $0x238] sm:$0xff]  }
 0x18c   : > { %5073 = vmatmul.mubr.bf16.vlgmr.msra.gmra.mrb[16].mxu1 %v6161_v24  ;;  %4936 = vmatprep.mubr.bf16.mxu0 %v6173_v32 }
 0x18d   : > { %5105 = vmatpush3.bf16.msra.mxu1 %v5649_v25  ;;  %5076 = vmatprep.mubr.bf16.mxu1 %v6167_v45  ;;  %v6252_v25 = vpack.c.bf16 %v2271_v60, %v2270_v56  ;;  %v5667_v56 = vld [vmem:[%s6538_s3 + $0x210] sm:$0xff]  }
 0x18e   : > { %5106 = vmatprep.subr.bf16.mxu1 %v5650_v46  ;;  %4965 = vmatpush3.bf16.msra.mxu0 %v5863_v36  ;;  %v2254_v36 = vld [vmem:[#allocation2 + $0xe9] sm:$0xff] }
 0x18f   : > { %4966 = vmatprep.subr.bf16.mxu0 %v5870_v37  ;;  %v6203_v15 = vpack.c.bf16 %v2255_v12, %v2254_v36  ;;  %v2573_v36 = vld [vmem:[#allocation2 + $0x1c7] sm:$0xff]  ;;  %v2862_v60 = vld [vmem:[#allocation2 + $0xb0] sm:$0xff] }
 0x190   : > { %v2593_v12 = vpack.c.bf16 %v2574_v63, %v2573_v36  ;;  %v2876_v63 = vld [vmem:[#allocation2 + $0x190] sm:$0xff]  ;;  %v2875_v36 = vld [vmem:[#allocation2 + $0x188] sm:$0xff] }
 0x191   : > { %5107 = vmatpush3.bf16.msra.mxu1 %v5650_v46  ;;  %v2590_v46 = vpack.c.bf16 %v2568_v62, %v2567_v44  ;;  %v2872_v62 = vld [vmem:[#allocation2 + $0x150] sm:$0xff] }
 0x192   : > { %5108 = vmatprep.subr.bf16.mxu1 %v5651_v58  ;;  %4967 = vmatpush3.bf16.msra.mxu0 %v5870_v37  ;;  %v1340_v37 = vld [vmem:[#allocation2 + $0x109] sm:$0xff] }
 0x193   : > { %4937 = vmatmul.mubr.bf16.gmra.mrb[40].mxu0 %v6185_v3  ;;  %4968 = vmatprep.subr.bf16.mxu0 %v5877_v38  ;;  %v6205_v17 = vpack.c.bf16 %v1341_v14, %v1340_v37  ;;  %v2578_v37 = vld [vmem:[#allocation2 + $0x20f] sm:$0xff]  ;;  %v2575_v14 = vld [vmem:[#allocation2 + $0x1e7] sm:$0xff] }
 0x194   : > { %5077 = vmatmul.mubr.bf16.gmra.mrb[20].mxu1 %v6173_v32  ;;  %4940 = vmatprep.mubr.bf16.mxu0 %v6187_v8 }
 0x195   : > { %5080 = vmatprep.mubr.bf16.mxu1 %v6185_v3  ;;  %5109 = vmatpush3.bf16.msra.mxu1 %v5651_v58  ;;  %v2572_v58 = vld [vmem:[#allocation2 + $0x1af] sm:$0xff] }
 0x196   : > { %5110 = vmatprep.subr.bf16.mxu1 %v5652_v10  ;;  %4969 = vmatpush3.bf16.msra.mxu0 %v5877_v38  ;;  %v2258_v38 = vld [vmem:[#allocation2 + $0x129] sm:$0xff] }
 0x197   : > { %4970 = vmatprep.subr.bf16.mxu0 %v5884_v39  ;;  %v6221_v21 = vpack.c.bf16 %v2259_v2, %v2258_v38  ;;  %v2577_v38 = vld [vmem:[#allocation2 + $0x207] sm:$0xff] }
 0x198   : > { %v2595_v2 = vpack.c.bf16 %v2578_v37, %v2577_v38  ;;  %v2880_v37 = vld [vmem:[#allocation2 + $0x1d0] sm:$0xff]  ;;  %v5674_v38 = vld [vmem:[%s6540_s5 + $0x8] sm:$0xff]  }
 0x199   : > { %5111 = vmatpush3.bf16.msra.mxu1 %v5652_v10  ;;  %v2592_v10 = vpack.c.bf16 %v2572_v58, %v2571_v43  ;;  %v2874_v58 = vld [vmem:[#allocation2 + $0x170] sm:$0xff]  ;;  %v2873_v43 = vld [vmem:[#allocation2 + $0x168] sm:$0xff] }
 0x19a   : > { %5112 = vmatprep.subr.bf16.mxu1 %v5653_v13  ;;  %4971 = vmatpush3.bf16.msra.mxu0 %v5884_v39  ;;  %v1344_v39 = vld [vmem:[#allocation2 + $0x149] sm:$0xff] }
 0x19b   : > { %4941 = vmatmul.mubr.bf16.gmra.mrb[44].mxu0 %v6203_v15  ;;  %4972 = vmatprep.subr.bf16.mxu0 %v5894_v41  ;;  %v6223_v22 = vpack.c.bf16 %v1345_v20, %v1344_v39  ;;  %v2580_v39 = vld [vmem:[#allocation2 + $0x22f] sm:$0xff] }
 0x19c   : > { %5081 = vmatmul.mubr.bf16.gmra.mrb[24].mxu1 %v6187_v8  ;;  %4944 = vmatprep.mubr.bf16.mxu0 %v6205_v17 }
 0x19d   : > { %5084 = vmatprep.mubr.bf16.mxu1 %v6203_v15  ;;  %5113 = vmatpush3.bf16.msra.mxu1 %v5653_v13  ;;  %v2576_v13 = vld [vmem:[#allocation2 + $0x1ef] sm:$0xff] }
 0x19e   : > { %5114 = vmatprep.subr.bf16.mxu1 %v5654_v59  ;;  %4973 = vmatpush3.bf16.msra.mxu0 %v5894_v41  ;;  %v2262_v41 = vld [vmem:[#allocation2 + $0x169] sm:$0xff] }
 0x19f   : > { %4974 = vmatprep.subr.bf16.mxu0 %v5901_v42  ;;  %v6236_v47 = vpack.c.bf16 %v2263_v26, %v2262_v41  ;;  %v2855_v41 = vld [vmem:[#allocation2 + $0x48] sm:$0xff] }
 0x1a1   : > { %5115 = vmatpush3.bf16.msra.mxu1 %v5654_v59  ;;  %v2594_v59 = vpack.c.bf16 %v2576_v13, %v2575_v14  ;;  %v2878_v13 = vld [vmem:[#allocation2 + $0x1b0] sm:$0xff]  ;;  %v2877_v14 = vld [vmem:[#allocation2 + $0x1a8] sm:$0xff] }
 0x1a2   : > { %5116 = vmatprep.subr.bf16.mxu1 %v5655_v19  ;;  %4975 = vmatpush3.bf16.msra.mxu0 %v5901_v42  ;;  %v6238_v42 = vpack.c.bf16 %v1349_v40, %v1348_v31  ;;  %v2860_v31 = vld [vmem:[#allocation2 + $0x90] sm:$0xff]  ;;  %v2857_v40 = vld [vmem:[#allocation2 + $0x68] sm:$0xff] }
 0x1a3   : > { %4945 = vmatmul.mubr.bf16.gmra.mrb[48].mxu0 %v6221_v21  ;;  %v2889_v52 = vpack.c.bf16 %v2860_v31, %v2859_v49  ;;  %v5677_v49 = vld [vmem:[%s6540_s5 + $0x20] sm:$0xff]  }
 0x1a4   : > { %5085 = vmatmul.mubr.bf16.gmra.mrb[28].mxu1 %v6205_v17  ;;  %4948 = vmatprep.mubr.bf16.mxu0 %v6223_v22 }
 0x1a5   : > { %5088 = vmatprep.mubr.bf16.mxu1 %v6221_v21  ;;  %5117 = vmatpush3.bf16.msra.mxu1 %v5655_v19  ;;  %v2579_v19 = vld [vmem:[#allocation2 + $0x227] sm:$0xff] }
 0x1a6   : > { %5118 = vmatprep.subr.bf16.mxu1 %v5656_v23  ;;  %v2596_v20 = vpack.c.bf16 %v2580_v39, %v2579_v19  ;;  %v2879_v19 = vld [vmem:[#allocation2 + $0x1c8] sm:$0xff] }
 0x1a7   : > { %v2899_v39 = vpack.c.bf16 %v2880_v37, %v2879_v19 }
 0x1a9   : > { %5119 = vmatpush3.bf16.msra.mxu1 %v5656_v23  ;;  %v2856_v23 = vld [vmem:[#allocation2 + $0x50] sm:$0xff] }
 0x1aa   : > { %5152 = vmatprep.subr.bf16.mxu1 %v5657_v29  ;;  %v2887_v26 = vpack.c.bf16 %v2856_v23, %v2855_v41  ;;  %v2882_v23 = vld [vmem:[#allocation2 + $0x1f0] sm:$0xff] }
 0x1ab   : > { %4949 = vmatmul.mubr.bf16.gmra.mrb[52].mxu0 %v6236_v47  ;;  %v2884_v41 = vld [vmem:[#allocation2 + $0x210] sm:$0xff] }
 0x1ac   : > { %5089 = vmatmul.mubr.bf16.gmra.mrb[0].mxu1 %v6223_v22  ;;  %4952 = vmatprep.mubr.bf16.mxu0 %v6238_v42 }
 0x1ad   : > { %5092 = vmatprep.mubr.bf16.mxu1 %v6236_v47 }
 0x1b3   : > { %4953 = vmatmul.mubr.bf16.gmra.mrb[56].mxu0 %v6244_v54 }
 0x1b4   : > { %5093 = vmatmul.mubr.bf16.gmra.mrb[4].mxu1 %v6238_v42  ;;  %4956 = vmatprep.mubr.bf16.mxu0 %v6246_v55 }
 0x1b5   : > { %5096 = vmatprep.mubr.bf16.mxu1 %v6244_v54 }
 0x1bb   : > { %4957 = vmatmul.mubr.bf16.gmra.mrb[60].mxu0 %v6252_v25 }
 0x1bc   : > { %5097 = vmatmul.mubr.bf16.gmra.mrb[8].mxu1 %v6246_v55  ;;  %4976 = vmatprep.mubr.bf16.mxu0 %v6061_v61  ;;  %v5659_v61 = vld [vmem:[%s6538_s3 + $0x1d0] sm:$0xff]  }
 0x1bd   : > { %5100 = vmatprep.mubr.bf16.mxu1 %v6252_v25 }
 0x1c3   : > { %4977 = vmatmul.mubr.bf16.vlgmr.msra.gmra.mrb[32].mxu0 %v6066_v4 }
 0x1c4   : > { %5101 = vmatmul.mubr.bf16.gmra.mrb[12].mxu1 %v6258_v7  ;;  %4980 = vmatprep.mubr.bf16.mxu0 %v6082_v16 }
 0x1c5   : > { %5120 = vmatprep.mubr.bf16.mxu1 %v6066_v4  ;;  %v5660_v4 = vld [vmem:[%s6538_s3 + $0x1d8] sm:$0xff]  }
 0x1cb   : > { %4981 = vmatmul.mubr.bf16.gmra.mrb[36].mxu0 %v6087_v18 }
 0x1cc   : > { %5121 = vmatmul.mubr.bf16.vlgmr.msra.gmra.mrb[16].mxu1 %v6082_v16  ;;  %4984 = vmatprep.mubr.bf16.mxu0 %v6102_v57  ;;  %v5661_v16 = vld [vmem:[%s6538_s3 + $0x1e0] sm:$0xff]  }
 0x1cd   : > { %5153 = vmatpush3.bf16.msra.mxu1 %v5657_v29  ;;  %5124 = vmatprep.mubr.bf16.mxu1 %v6087_v18  ;;  %v5662_v18 = vld [vmem:[%s6538_s3 + $0x1e8] sm:$0xff]   ;;  %v2858_v29 = vld [vmem:[#allocation2 + $0x70] sm:$0xff] }
 0x1ce   : > { %5154 = vmatprep.subr.bf16.mxu1 %v5658_v5  ;;  %v2888_v48 = vpack.c.bf16 %v2858_v29, %v2857_v40  ;;  %v5676_v29 = vld [vmem:[%s6540_s5 + $0x18] sm:$0xff]   ;;  %v2883_v40 = vld [vmem:[#allocation2 + $0x208] sm:$0xff] }
 0x1d1   : > { %5155 = vmatpush3.bf16.msra.mxu1 %v5658_v5  ;;  %v2890_v5 = vpack.c.bf16 %v2862_v60, %v2861_v53 }
 0x1d2   : > { %5156 = vmatprep.subr.bf16.mxu1 %v5659_v61 }
 0x1d3   : > { %4985 = vmatmul.mubr.bf16.gmra.mrb[40].mxu0 %v6104_v11 }
 0x1d4   : > { %5125 = vmatmul.mubr.bf16.gmra.mrb[20].mxu1 %v6102_v57  ;;  %4988 = vmatprep.mubr.bf16.mxu0 %v6122_v9  ;;  %v5663_v57 = vld [vmem:[%s6538_s3 + $0x1f0] sm:$0xff]  }
 0x1d5   : > { %5128 = vmatprep.mubr.bf16.mxu1 %v6104_v11  ;;  %5157 = vmatpush3.bf16.msra.mxu1 %v5659_v61  ;;  %v2564_v11 = vld [vmem:[#allocation2 + $0x12f] sm:$0xff] }
 0x1d6   : > { %5158 = vmatprep.subr.bf16.mxu1 %v5660_v4  ;;  %v2588_v33 = vpack.c.bf16 %v2564_v11, %v2563_v30  ;;  %v2863_v61 = vld [vmem:[#allocation2 + $0xc8] sm:$0xff]  ;;  %v2868_v11 = vld [vmem:[#allocation2 + $0x110] sm:$0xff] }
 0x1d9   : > { %5159 = vmatpush3.bf16.msra.mxu1 %v5660_v4  ;;  %v5668_v4 = vld [vmem:[%s6538_s3 + $0x218] sm:$0xff]  }
 0x1da   : > { %5160 = vmatprep.subr.bf16.mxu1 %v5661_v16 }
 0x1db   : > { %4989 = vmatmul.mubr.bf16.gmra.mrb[44].mxu0 %v6124_v27 }
 0x1dc   : > { %5129 = vmatmul.mubr.bf16.gmra.mrb[24].mxu1 %v6122_v9  ;;  %v2589_v9 = vpack.c.bf16 %v2566_v28, %v2565_v0  ;;  %v2865_v28 = vld [vmem:[#allocation2 + $0xe8] sm:$0xff] }
 0x1dd   : > { %5132 = vmatprep.mubr.bf16.mxu1 %v6124_v27  ;;  %5161 = vmatpush3.bf16.msra.mxu1 %v5661_v16  ;;  %v5665_v27 = vld [vmem:[%s6538_s3 + $0x200] sm:$0xff]   ;;  %v2891_v16 = vpack.c.bf16 %v2864_v51, %v2863_v61  ;;  %v5670_v0 = vld [vmem:[%s6538_s3 + $0x228] sm:$0xff]  }
 0x1de   : > { %5162 = vmatprep.subr.bf16.mxu1 %v5662_v18 }
 0x1e1   : > { %5163 = vmatpush3.bf16.msra.mxu1 %v5662_v18  ;;  %v5669_v18 = vld [vmem:[%s6538_s3 + $0x220] sm:$0xff]  }
 0x1e2   : > { %5164 = vmatprep.subr.bf16.mxu1 %v5663_v57 }
 0x1e4   : > { %5133 = vmatmul.mubr.bf16.gmra.mrb[28].mxu1 %v2588_v33  ;;  %v2867_v33 = vld [vmem:[#allocation2 + $0x108] sm:$0xff] }
 0x1e5   : > { %5136 = vmatprep.mubr.bf16.mxu1 %v2589_v9  ;;  %5165 = vmatpush3.bf16.msra.mxu1 %v5663_v57  ;;  %v2866_v57 = vld [vmem:[#allocation2 + $0xf0] sm:$0xff] }
 0x1e6   : > { %5166 = vmatprep.subr.bf16.mxu1 %v5664_v1  ;;  %v2892_v30 = vpack.c.bf16 %v2866_v57, %v2865_v28  ;;  %v5671_v9 = vld [vmem:[%s6538_s3 + $0x230] sm:$0xff]  }
 0x1e9   : > { %5167 = vmatpush3.bf16.msra.mxu1 %v5664_v1  ;;  %v2893_v1 = vpack.c.bf16 %v2868_v11, %v2867_v33 }
 0x1ea   : > { %5200 = vmatprep.subr.bf16.mxu1 %v5665_v27 }
 0x1ec   : > { %5137 = vmatmul.mubr.bf16.gmra.mrb[0].mxu1 %v2590_v46  ;;  %v2871_v46 = vld [vmem:[#allocation2 + $0x148] sm:$0xff] }
 0x1ed   : > { %5140 = vmatprep.mubr.bf16.mxu1 %v2591_v35  ;;  %v2895_v35 = vpack.c.bf16 %v2872_v62, %v2871_v46  ;;  %v5680_v62 = vld [vmem:[%s6540_s5 + $0x38] sm:$0xff]  }
 0x1f4   : > { %5141 = vmatmul.mubr.bf16.gmra.mrb[4].mxu1 %v2592_v10  ;;  %v2896_v10 = vpack.c.bf16 %v2874_v58, %v2873_v43  ;;  %v6402_v58 = vld [vmem:[%s6539_s4] ss:$0 sm:$0xff] }
 0x1f5   : > { %5144 = vmatprep.mubr.bf16.mxu1 %v2593_v12  ;;  %v2897_v12 = vpack.c.bf16 %v2876_v63, %v2875_v36 }
 0x1fc   : > { %5145 = vmatmul.mubr.bf16.gmra.mrb[8].mxu1 %v2594_v59  ;;  %v5673_v59 = vld [vmem:[%s6540_s5] sm:$0xff]  }
 0x1fd   : > { %5148 = vmatprep.mubr.bf16.mxu1 %v2595_v2  ;;  %v2898_v2 = vpack.c.bf16 %v2878_v13, %v2877_v14  ;;  %5248 = vmatprep.subr.bf16.mxu0 %v5673_v59 }
 0x1fe   : > { %5249 = vmatpush3.bf16.msra.mxu0 %v5673_v59 }
 0x1ff   : > { %5250 = vmatprep.subr.bf16.mxu0 %v5674_v38 }
 0x202   : > { %5251 = vmatpush3.bf16.msra.mxu0 %v5674_v38 }
 0x204   : > { %5149 = vmatmul.mubr.bf16.gmra.mrb[12].mxu1 %v2596_v20  ;;  %v5675_v20 = vld [vmem:[%s6540_s5 + $0x10] sm:$0xff]  }
 0x205   : > { %5168 = vmatprep.mubr.bf16.mxu1 %v2887_v26  ;;  %v2881_v26 = vld [vmem:[#allocation2 + $0x1e8] sm:$0xff]  ;;  %5252 = vmatprep.subr.bf16.mxu0 %v5675_v20 }
 0x206   : > { %v2900_v31 = vpack.c.bf16 %v2882_v23, %v2881_v26  ;;  %5253 = vmatpush3.bf16.msra.mxu0 %v5675_v20 }
 0x207   : > { %5254 = vmatprep.subr.bf16.mxu0 %v5676_v29 }
 0x20a   : > { %5255 = vmatpush3.bf16.msra.mxu0 %v5676_v29 }
 0x20b   : > { %5256 = vmatprep.subr.bf16.mxu0 %v5677_v49 }
 0x20c   : > { %5169 = vmatmul.mubr.bf16.vlgmr.msra.gmra.mrb[16].mxu1 %v2888_v48  ;;  %v2901_v48 = vpack.c.bf16 %v2884_v41, %v2883_v40 }
 0x20d   : > { %5201 = vmatpush3.bf16.msra.mxu1 %v5665_v27  ;;  %5172 = vmatprep.mubr.bf16.mxu1 %v2889_v52  ;;  %v2870_v27 = vld [vmem:[#allocation2 + $0x130] sm:$0xff] }
 0x20e   : > { %5202 = vmatprep.subr.bf16.mxu1 %v5666_v50  ;;  %v2894_v44 = vpack.c.bf16 %v2870_v27, %v2869_v6  ;;  %5257 = vmatpush3.bf16.msra.mxu0 %v5677_v49 }
 0x211   : > { %5203 = vmatpush3.bf16.msra.mxu1 %v5666_v50  ;;  %v5697_v50 = vld [vmem:[#allocation2] sm:$0xff] }
 0x212   : > { %5204 = vmatprep.subr.bf16.mxu1 %v5667_v56  ;;  %v2902_v52 = vpack.c.bf16 %v5697_v50, %v5697_v50 }
 0x214   : > { %5173 = vmatmul.mubr.bf16.gmra.mrb[20].mxu1 %v2890_v5 }
 0x215   : > { %5176 = vmatprep.mubr.bf16.mxu1 %v2891_v16  ;;  %5205 = vmatpush3.bf16.msra.mxu1 %v5667_v56 }
 0x216   : > { %5206 = vmatprep.subr.bf16.mxu1 %v5668_v4 }
 0x219   : > { %5207 = vmatpush3.bf16.msra.mxu1 %v5668_v4 }
 0x21a   : > { %5208 = vmatprep.subr.bf16.mxu1 %v5669_v18 }
 0x21c   : > { %5177 = vmatmul.mubr.bf16.gmra.mrb[24].mxu1 %v2892_v30  ;;  %v5678_v30 = vld [vmem:[%s6540_s5 + $0x28] sm:$0xff]  }
 0x21d   : > { %5180 = vmatprep.mubr.bf16.mxu1 %v2893_v1  ;;  %5209 = vmatpush3.bf16.msra.mxu1 %v5669_v18  ;;  %v5679_v1 = vld [vmem:[%s6540_s5 + $0x30] sm:$0xff]  }
 0x21e   : > { %5210 = vmatprep.subr.bf16.mxu1 %v5670_v0  ;;  %5258 = vmatprep.subr.bf16.mxu0 %v5678_v30 }
 0x21f   : > { %5259 = vmatpush3.bf16.msra.mxu0 %v5678_v30 }
 0x220   : > { %5260 = vmatprep.subr.bf16.mxu0 %v5679_v1 }
 0x221   : > { %5211 = vmatpush3.bf16.msra.mxu1 %v5670_v0 }
 0x222   : > { %5212 = vmatprep.subr.bf16.mxu1 %v5671_v9 }
 0x223   : > { %5261 = vmatpush3.bf16.msra.mxu0 %v5679_v1 }
 0x224   : > { %5181 = vmatmul.mubr.bf16.gmra.mrb[28].mxu1 %v2894_v44  ;;  %5262 = vmatprep.subr.bf16.mxu0 %v5680_v62 }
 0x225   : > { %5184 = vmatprep.mubr.bf16.mxu1 %v2895_v35  ;;  %5213 = vmatpush3.bf16.msra.mxu1 %v5671_v9 }
 0x226   : > { %5214 = vmatprep.subr.bf16.mxu1 %v5672_v34 }
 0x227   : > { %5263 = vmatpush3.bf16.msra.mxu0 %v5680_v62 }
 0x229   : > { %5215 = vmatpush3.bf16.msra.mxu1 %v5672_v34 }
 0x22c   : > { %5185 = vmatmul.mubr.bf16.gmra.mrb[0].mxu1 %v2896_v10 }
 0x22d   : > { %5188 = vmatprep.mubr.bf16.mxu1 %v2897_v12 }
 0x234   : > { %5189 = vmatmul.mubr.bf16.gmra.mrb[4].mxu1 %v2898_v2 }
 0x235   : > { %5192 = vmatprep.mubr.bf16.mxu1 %v2899_v39 }
 0x23c   : > { %5193 = vmatmul.mubr.bf16.gmra.mrb[8].mxu1 %v2900_v31 }
 0x23d   : > { %5196 = vmatprep.mubr.bf16.mxu1 %v2901_v48 }
 0x244   : > { %5197 = vmatmul.mubr.bf16.gmra.mrb[12].mxu1 %v2902_v52 }
 0x245   : > { %5216 = vmatprep.mubr.bf16.mxu1 %v6161_v24 }
 0x24c   : > { %5217 = vmatmul.mubr.bf16.vlgmr.msra.gmra.mrb[16].mxu1 %v6167_v45 }
 0x24d   : > { %5220 = vmatprep.mubr.bf16.mxu1 %v6173_v32 }
 0x254   : > { %5221 = vmatmul.mubr.bf16.gmra.mrb[20].mxu1 %v6185_v3 }
 0x255   : > { %5224 = vmatprep.mubr.bf16.mxu1 %v6187_v8  ;;  %v3191_v8 = vld [vmem:[#allocation2 + $0x229] sm:$0xff] }
 0x25c   : > { %5225 = vmatmul.mubr.bf16.gmra.mrb[24].mxu1 %v6203_v15  ;;  %v3192_v15 = vld [vmem:[#allocation2 + $0x231] sm:$0xff] }
 0x25d   : > { %5228 = vmatprep.mubr.bf16.mxu1 %v6205_v17 }
 0x264   : > { %5229 = vmatmul.mubr.bf16.gmra.mrb[28].mxu1 %v6221_v21 }
 0x265   : > { %5232 = vmatprep.mubr.bf16.mxu1 %v6223_v22  ;;  %v3208_v22 = vpack.c.bf16 %v3192_v15, %v3191_v8 }
 0x26c   : > { %5233 = vmatmul.mubr.bf16.gmra.mrb[0].mxu1 %v6236_v47 }
 0x26d   : > { %5236 = vmatprep.mubr.bf16.mxu1 %v6238_v42 }
 0x274   : > { %5237 = vmatmul.mubr.bf16.gmra.mrb[4].mxu1 %v6244_v54 }
 0x275   : > { %5240 = vmatprep.mubr.bf16.mxu1 %v6246_v55 }
 0x276   : > { %v6348_v24 = vpop.f32.mrb[48].mxu0 }
 0x277   : > { %v6350_v45 = vpop.f32.mrb[49].mxu0 }
 0x278   : > { %v6352_v32 = vpop.f32.mrb[50].mxu0 }
 0x279   : > { %v6354_v3 = vpop.f32.mrb[51].mxu0 }
 0x27c   : > { %5241 = vmatmul.mubr.bf16.gmra.mrb[8].mxu1 %v6252_v25 }
 0x27d   : > { %5244 = vmatprep.mubr.bf16.mxu1 %v6258_v7 }
 0x27e   : > { %v6358_v17 = vpop.f32.mrb[52].mxu0 }
 0x27f   : > { %v6360_v21 = vpop.f32.mrb[53].mxu0 }
 0x280   : > { %v6362_v47 = vpop.f32.mrb[54].mxu0 }
 0x281   : > { %v6364_v42 = vpop.f32.mrb[55].mxu0 }
 0x284   : > { %5245 = vmatmul.mubr.bf16.gmra.mrb[12].mxu1 %v3208_v22 }
 0x286   : > { %v6366_v54 = vpop.f32.mrb[56].mxu0 }
 0x287   : > { %v6368_v55 = vpop.f32.mrb[57].mxu0 }
 0x288   : > { %v6370_v56 = vpop.f32.mrb[58].mxu0 }
 0x289   : > { %v6372_v25 = vpop.f32.mrb[59].mxu0 }
 0x28e   : > { %v6374_v7 = vpop.f32.mrb[60].mxu0 }
 0x28f   : > { %v6376_v60 = vpop.f32.mrb[61].mxu0 }
 0x290   : > { %v6378_v51 = vpop.f32.mrb[62].mxu0 }
 0x291   : > { %v6380_v53 = vpop.f32.mrb[63].mxu0 }
 0x296   : > { %v4978_v5 = vpop.f32.mrb[32].mxu0 }
 0x297   : > { %v1777_v61 = vpop.f32.mrb[33].mxu0 }
 0x298   : > { %v4979_v4 = vpop.f32.mrb[34].mxu0 }
 0x299   : > { %v1780_v16 = vpop.f32.mrb[35].mxu0 }
 0x29e   : > { %v4982_v18 = vpop.f32.mrb[36].mxu0 }
 0x29f   : > { %v1793_v57 = vpop.f32.mrb[37].mxu0 }
 0x2a0   : > { %v4983_v11 = vpop.f32.mrb[38].mxu0 }
 0x2a1   : > { %v1796_v28 = vpop.f32.mrb[39].mxu0 }
 0x2a6   : > { %v4986_v33 = vpop.f32.mrb[40].mxu0 }
 0x2a7   : > { %v1809_v0 = vpop.f32.mrb[41].mxu0 }
 0x2a8   : > { %v4987_v9 = vpop.f32.mrb[42].mxu0 }
 0x2a9   : > { %v1812_v27 = vpop.f32.mrb[43].mxu0 }
 0x2ae   : > { %v6391_v6 = vpop.f32.mrb[44].mxu0 }
 0x2af   : > { %v6393_v44 = vpop.f32.mrb[45].mxu0 }
 0x2b0   : > { %v6395_v46 = vpop.f32.mrb[46].mxu0 }
 0x2b1   : > { %v6397_v34 = vpop.f32.mrb[47].mxu0 }
 0x31f   : > { %v5218_v35 = vpop.f32.mrb[16].mxu1 }
 0x320   : > { %v5312_v63 = vadd.f32 %v5218_v35, %v4978_v5  ;;  %v3308_v43 = vpop.f32.mrb[17].mxu1 }
 0x321   : > { %v5313_v10 = vadd.f32 %v3308_v43, %v1777_v61  ;;  %v5219_v36 = vpop.f32.mrb[18].mxu1 }
 0x322   : > { %v3476_v12 = vadd.f32 %v5312_v63, %v6402_v58  ;;  %v5314_v13 = vadd.f32 %v5219_v36, %v4979_v4  ;;  %v3311_v37 = vpop.f32.mrb[19].mxu1 }
 0x323   : > { %v3474_v14 = vadd.f32 %v5313_v10, %v6402_v58  ;;  %v5315_v59 = vadd.f32 %v3311_v37, %v1780_v16 }
 0x324   : > { %v3477_v38 = vadd.f32 %v5314_v13, %v6402_v58  ;;  %v3508_v19 = vmax.f32 %v3476_v12, 0.0 }
 0x325   : > { %v3475_v2 = vadd.f32 %v5315_v59, %v6402_v58  ;;  %v3506_v20 = vmax.f32 %v3474_v14, 0.0 }
 0x326   : > { %v3509_v39 = vmax.f32 %v3477_v38, 0.0 }
 0x327   : > { %v3507_v23 = vmax.f32 %v3475_v2, 0.0  ;;  %v5222_v41 = vpop.f32.mrb[20].mxu1 }
 0x328   : > { %v3539_v26 = vpack.c.bf16 %v3509_v39, %v3508_v19  ;;  %v5316_v29 = vadd.f32 %v5222_v41, %v4982_v18  ;;  %v3324_v31 = vpop.f32.mrb[21].mxu1 }
 0x329   : > { %v5317_v40 = vadd.f32 %v3324_v31, %v1793_v57  ;;  %v5223_v48 = vpop.f32.mrb[22].mxu1  ;;  %v3538_v49 = vpack.c.bf16 %v3507_v23, %v3506_v20 }
 0x32a   : > { %v3480_v50 = vadd.f32 %v5316_v29, %v6402_v58  ;;  %v5318_v52 = vadd.f32 %v5223_v48, %v4983_v11  ;;  %v3327_v8 = vpop.f32.mrb[23].mxu1 }
 0x32b   : > { %v3478_v15 = vadd.f32 %v5317_v40, %v6402_v58  ;;  %v5319_v22 = vadd.f32 %v3327_v8, %v1796_v28  ;;  %5264 = vmatprep.mubr.bf16.mxu0 %v3538_v49 }
 0x32c   : > { %v3481_v5 = vadd.f32 %v5318_v52, %v6402_v58  ;;  %5265 = vmatmul.mubr.bf16.vlgmr.msra.gmra.mrb[64].mxu0 %v3539_v26  ;;  %v3512_v4 = vmax.f32 %v3480_v50, 0.0 }
 0x32d   : > { %v3479_v61 = vadd.f32 %v5319_v22, %v6402_v58  ;;  %v3510_v18 = vmax.f32 %v3478_v15, 0.0 }
 0x32e   : > { %v3513_v16 = vmax.f32 %v3481_v5, 0.0 }
 0x32f   : > { %v3511_v30 = vmax.f32 %v3479_v61, 0.0  ;;  %v5226_v57 = vpop.f32.mrb[24].mxu1 }
 0x330   : > { %v5320_v1 = vadd.f32 %v5226_v57, %v4986_v33  ;;  %v3340_v62 = vpop.f32.mrb[25].mxu1  ;;  %v3541_v35 = vpack.c.bf16 %v3513_v16, %v3512_v4 }
 0x331   : > { %v5321_v63 = vadd.f32 %v3340_v62, %v1809_v0  ;;  %v5227_v11 = vpop.f32.mrb[26].mxu1  ;;  %v3540_v43 = vpack.c.bf16 %v3511_v30, %v3510_v18 }
 0x332   : > { %v3484_v10 = vadd.f32 %v5320_v1, %v6402_v58  ;;  %v5322_v28 = vadd.f32 %v5227_v11, %v4987_v9  ;;  %v3343_v36 = vpop.f32.mrb[27].mxu1 }
 0x333   : > { %v3482_v12 = vadd.f32 %v5321_v63, %v6402_v58  ;;  %v5323_v13 = vadd.f32 %v3343_v36, %v1812_v27  ;;  %5268 = vmatprep.mubr.bf16.mxu0 %v3540_v43 }
 0x334   : > { %v3485_v37 = vadd.f32 %v5322_v28, %v6402_v58  ;;  %5269 = vmatmul.mubr.bf16.gmra.mrb[68].mxu0 %v3541_v35  ;;  %v3516_v59 = vmax.f32 %v3484_v10, 0.0 }
 0x335   : > { %v3483_v14 = vadd.f32 %v5323_v13, %v6402_v58  ;;  %v3514_v38 = vmax.f32 %v3482_v12, 0.0 }
 0x336   : > { %v3517_v33 = vmax.f32 %v3485_v37, 0.0 }
 0x337   : > { %v3515_v2 = vmax.f32 %v3483_v14, 0.0  ;;  %v5230_v0 = vpop.f32.mrb[28].mxu1 }
 0x338   : > { %v5324_v19 = vadd.f32 %v5230_v0, %v6391_v6  ;;  %v3356_v39 = vpop.f32.mrb[29].mxu1  ;;  %v3543_v20 = vpack.c.bf16 %v3517_v33, %v3516_v59 }
 0x339   : > { %v5325_v9 = vadd.f32 %v3356_v39, %v6393_v44  ;;  %v5231_v23 = vpop.f32.mrb[30].mxu1  ;;  %v3542_v41 = vpack.c.bf16 %v3515_v2, %v3514_v38 }
 0x33a   : > { %v3488_v27 = vadd.f32 %v5324_v19, %v6402_v58  ;;  %v5326_v26 = vadd.f32 %v5231_v23, %v6395_v46  ;;  %v3359_v29 = vpop.f32.mrb[31].mxu1 }
 0x33b   : > { %v3486_v31 = vadd.f32 %v5325_v9, %v6402_v58  ;;  %v5327_v40 = vadd.f32 %v3359_v29, %v6397_v34  ;;  %5272 = vmatprep.mubr.bf16.mxu0 %v3542_v41 }
 0x33c   : > { %v3489_v48 = vadd.f32 %v5326_v26, %v6402_v58  ;;  %5273 = vmatmul.mubr.bf16.gmra.mrb[72].mxu0 %v3543_v20  ;;  %v3520_v49 = vmax.f32 %v3488_v27, 0.0 }
 0x33d   : > { %v3487_v6 = vadd.f32 %v5327_v40, %v6402_v58  ;;  %v3518_v44 = vmax.f32 %v3486_v31, 0.0 }
 0x33e   : > { %v3521_v50 = vmax.f32 %v3489_v48, 0.0 }
 0x33f   : > { %v3519_v52 = vmax.f32 %v3487_v6, 0.0  ;;  %v5234_v8 = vpop.f32.mrb[0].mxu1 }
 0x340   : > { %v5328_v15 = vadd.f32 %v5234_v8, %v6348_v24  ;;  %v3372_v22 = vpop.f32.mrb[1].mxu1  ;;  %v3545_v46 = vpack.c.bf16 %v3521_v50, %v3520_v49 }
 0x341   : > { %v5329_v5 = vadd.f32 %v3372_v22, %v6350_v45  ;;  %v5235_v61 = vpop.f32.mrb[2].mxu1  ;;  %v3544_v4 = vpack.c.bf16 %v3519_v52, %v3518_v44 }
 0x342   : > { %v3492_v34 = vadd.f32 %v5328_v15, %v6402_v58  ;;  %v5330_v16 = vadd.f32 %v5235_v61, %v6352_v32  ;;  %v3375_v18 = vpop.f32.mrb[3].mxu1 }
 0x343   : > { %v3490_v30 = vadd.f32 %v5329_v5, %v6402_v58  ;;  %v5331_v57 = vadd.f32 %v3375_v18, %v6354_v3  ;;  %5276 = vmatprep.mubr.bf16.mxu0 %v3544_v4 }
 0x344   : > { %v3493_v1 = vadd.f32 %v5330_v16, %v6402_v58  ;;  %5277 = vmatmul.mubr.bf16.gmra.mrb[76].mxu0 %v3545_v46  ;;  %v3524_v62 = vmax.f32 %v3492_v34, 0.0 }
 0x345   : > { %v3491_v24 = vadd.f32 %v5331_v57, %v6402_v58  ;;  %v3522_v45 = vmax.f32 %v3490_v30, 0.0 }
 0x346   : > { %v3525_v35 = vmax.f32 %v3493_v1, 0.0 }
 0x347   : > { %v3523_v63 = vmax.f32 %v3491_v24, 0.0  ;;  %v5238_v11 = vpop.f32.mrb[4].mxu1 }
 0x348   : > { %v5332_v43 = vadd.f32 %v5238_v11, %v6358_v17  ;;  %v3388_v10 = vpop.f32.mrb[5].mxu1  ;;  %v3547_v32 = vpack.c.bf16 %v3525_v35, %v3524_v62  ;;  %v5699_v62 = vld [vmem:[%s5789_s12] sm:$0xff]  }
 0x349   : > { %v5333_v28 = vadd.f32 %v3388_v10, %v6360_v21  ;;  %v5239_v36 = vpop.f32.mrb[6].mxu1  ;;  %v3546_v12 = vpack.c.bf16 %v3523_v63, %v3522_v45  ;;  %v3786_v35 = vunpack.c.l.bf16 %v5699_v62 }
 0x34a   : > { %v3496_v3 = vadd.f32 %v5332_v43, %v6402_v58  ;;  %v5334_v13 = vadd.f32 %v5239_v36, %v6362_v47  ;;  %v3391_v37 = vpop.f32.mrb[7].mxu1  ;;  %v3787_v43 = vunpack.c.h.bf16 %v5699_v62 }
 0x34b   : > { %v3494_v14 = vadd.f32 %v5333_v28, %v6402_v58  ;;  %v5335_v59 = vadd.f32 %v3391_v37, %v6364_v42  ;;  %5280 = vmatprep.mubr.bf16.mxu0 %v3546_v12 }
 0x34c   : > { %v3497_v33 = vadd.f32 %v5334_v13, %v6402_v58  ;;  %5281 = vmatmul.mubr.bf16.gmra.mrb[80].mxu0 %v3547_v32  ;;  %v3528_v38 = vmax.f32 %v3496_v3, 0.0 }
 0x34d   : > { %v3495_v17 = vadd.f32 %v5335_v59, %v6402_v58  ;;  %v3526_v21 = vmax.f32 %v3494_v14, 0.0 }
 0x34e   : > { %v3529_v2 = vmax.f32 %v3497_v33, 0.0 }
 0x34f   : > { %v3527_v0 = vmax.f32 %v3495_v17, 0.0  ;;  %v5242_v19 = vpop.f32.mrb[8].mxu1  ;;  %v5700_v17 = vld [vmem:[%s5789_s12 + $0x18] sm:$0xff]  }
 0x350   : > { %v5336_v39 = vadd.f32 %v5242_v19, %v6366_v54  ;;  %v3404_v20 = vpop.f32.mrb[9].mxu1  ;;  %v3549_v47 = vpack.c.bf16 %v3529_v2, %v3528_v38  ;;  %v3792_v38 = vunpack.c.l.bf16 %v5700_v17  ;;  %v5701_v19 = vld [vmem:[%s5789_s12 + $0x10] sm:$0xff]  }
 0x351   : > { %v5337_v9 = vadd.f32 %v3404_v20, %v6368_v55  ;;  %v5243_v23 = vpop.f32.mrb[10].mxu1  ;;  %v3548_v41 = vpack.c.bf16 %v3527_v0, %v3526_v21 }
 0x352   : > { %v3500_v42 = vadd.f32 %v5336_v39, %v6402_v58  ;;  %v5338_v27 = vadd.f32 %v5243_v23, %v6370_v56  ;;  %v3407_v26 = vpop.f32.mrb[11].mxu1  ;;  %v3790_v39 = vunpack.c.l.bf16 %v5701_v19  ;;  %v3793_v23 = vunpack.c.h.bf16 %v5700_v17 }
 0x353   : > { %v3498_v29 = vadd.f32 %v5337_v9, %v6402_v58  ;;  %v5339_v31 = vadd.f32 %v3407_v26, %v6372_v25  ;;  %5284 = vmatprep.mubr.bf16.mxu0 %v3548_v41  ;;  %v3791_v26 = vunpack.c.h.bf16 %v5701_v19 }
 0x354   : > { %v3501_v40 = vadd.f32 %v5338_v27, %v6402_v58  ;;  %5285 = vmatmul.mubr.bf16.gmra.mrb[84].mxu0 %v3549_v47  ;;  %v3532_v48 = vmax.f32 %v3500_v42, 0.0 }
 0x355   : > { %v3499_v54 = vadd.f32 %v5339_v31, %v6402_v58  ;;  %v3530_v55 = vmax.f32 %v3498_v29, 0.0 }
 0x356   : > { %v3533_v6 = vmax.f32 %v3501_v40, 0.0 }
 0x357   : > { %v3531_v49 = vmax.f32 %v3499_v54, 0.0  ;;  %v5246_v50 = vpop.f32.mrb[12].mxu1 }
 0x358   : > { %v5340_v44 = vadd.f32 %v5246_v50, %v6374_v7  ;;  %v3420_v52 = vpop.f32.mrb[13].mxu1  ;;  %v3551_v56 = vpack.c.bf16 %v3533_v6, %v3532_v48 }
 0x359   : > { %v5341_v8 = vadd.f32 %v3420_v52, %v6376_v60  ;;  %v5247_v15 = vpop.f32.mrb[14].mxu1  ;;  %v3550_v22 = vpack.c.bf16 %v3531_v49, %v3530_v55 }
 0x35a   : > { %v3504_v25 = vadd.f32 %v5340_v44, %v6402_v58  ;;  %v5342_v46 = vadd.f32 %v5247_v15, %v6378_v51  ;;  %v3423_v5 = vpop.f32.mrb[15].mxu1  ;;  %v6459_v51 = vld [vmem:[%s6541_s6] ss:$0 sm:$0xff]  ;;  %v5702_v44 = vld [vmem:[%s5789_s12 + $0x28] sm:$0xff]  }
 0x35b   : > { %v3502_v61 = vadd.f32 %v5341_v8, %v6402_v58  ;;  %v5343_v4 = vadd.f32 %v3423_v5, %v6380_v53  ;;  %5288 = vmatprep.mubr.bf16.mxu0 %v3550_v22  ;;  %v5698_v53 = vld [vmem:[%s5789_s12 + $0x8] sm:$0xff]   ;;  %v3796_v52 = vunpack.c.l.bf16 %v5702_v44  ;;  %v5703_v22 = vld [vmem:[%s5789_s12 + $0x20] sm:$0xff]  }
 0x35c   : > { %v3505_v7 = vadd.f32 %v5342_v46, %v6402_v58  ;;  %5289 = vmatmul.mubr.bf16.gmra.mrb[88].mxu0 %v3551_v56  ;;  %v3536_v60 = vmax.f32 %v3504_v25, 0.0  ;;  %v3788_v24 = vunpack.c.l.bf16 %v5698_v53  ;;  %v3789_v11 = vunpack.c.h.bf16 %v5698_v53 }
 0x35d   : > { %v3503_v34 = vadd.f32 %v5343_v4, %v6402_v58  ;;  %v3534_v18 = vmax.f32 %v3502_v61, 0.0  ;;  %v3794_v25 = vunpack.c.l.bf16 %v5703_v22  ;;  %v3797_v4 = vunpack.c.h.bf16 %v5702_v44 }
 0x35e   : > { %v3537_v16 = vmax.f32 %v3505_v7, 0.0 }
 0x35f   : > { %v3535_v30 = vmax.f32 %v3503_v34, 0.0 }
 0x360   : > { %v3553_v57 = vpack.c.bf16 %v3537_v16, %v3536_v60  ;;  %v3795_v16 = vunpack.c.h.bf16 %v5703_v22 }
 0x361   : > { %v3552_v1 = vpack.c.bf16 %v3535_v30, %v3534_v18 }
 0x363   : > { %5292 = vmatprep.mubr.bf16.mxu0 %v3552_v1 }
 0x364   : > { %5293 = vmatmul.mubr.bf16.gmra.mrb[92].mxu0 %v3553_v57 }
 0x3ff   : > { %v5266_v45 = vpop.f32.mrb[64].mxu0 }
 0x400   : > { %v3668_v58 = vadd.f32 %v5266_v45, %v6459_v51  ;;  %v3659_v63 = vpop.f32.mrb[65].mxu0 }
 0x401   : > { %v3660_v10 = vadd.f32 %v6459_v51, %v3659_v63  ;;  %v5267_v32 = vpop.f32.mrb[66].mxu0 }
 0x402   : > { %v3820_v28 = vadd.f32 %v3788_v24, %v3668_v58  ;;  %v3671_v36 = vadd.f32 %v5267_v32, %v6459_v51  ;;  %v3662_v12 = vpop.f32.mrb[67].mxu0  ;;  %v5704_v58 = vld [vmem:[%s5789_s12 + $0x38] sm:$0xff]   ;;  %v5705_v32 = vld [vmem:[%s5789_s12 + $0x30] sm:$0xff]  }
 0x403   : > { %v3818_v3 = vadd.f32 %v3786_v35, %v3660_v10  ;;  %v3663_v13 = vadd.f32 %v6459_v51, %v3662_v12  ;;  %v3800_v63 = vunpack.c.l.bf16 %v5704_v58 }
 0x404   : > { %v3821_v37 = vadd.f32 %v3789_v11, %v3671_v36  ;;  %v3852_v59 = vmax.f32 %v3820_v28, 0.0  ;;  %v3798_v28 = vunpack.c.l.bf16 %v5705_v32 }
 0x405   : > { %v3819_v14 = vadd.f32 %v3787_v43, %v3663_v13  ;;  %v3850_v2 = vmax.f32 %v3818_v3, 0.0  ;;  %v3801_v13 = vunpack.c.h.bf16 %v5704_v58 }
 0x406   : > { %v3853_v33 = vmax.f32 %v3821_v37, 0.0 }
 0x407   : > { %v3851_v21 = vmax.f32 %v3819_v14, 0.0  ;;  %v5270_v0 = vpop.f32.mrb[68].mxu0 }
 0x408   : > { %v4417_v20 = vpack.c.bf16 %v3853_v33, %v3852_v59  ;;  %v3684_v47 = vadd.f32 %v5270_v0, %v6459_v51  ;;  %v3675_v9 = vpop.f32.mrb[69].mxu0  ;;  %v3799_v33 = vunpack.c.h.bf16 %v5705_v32 }
 0x409   : > { %v4412_v41 = vpack.c.bf16 %v3851_v21, %v3850_v2  ;;  %v3676_v42 = vadd.f32 %v6459_v51, %v3675_v9  ;;  %v5271_v27 = vpop.f32.mrb[70].mxu0  ;;  %v5706_v9 = vld [vmem:[%s5789_s12 + $0x48] sm:$0xff]  }
 0x40a   : > { %4489 = vst [vmem:[%s6473_s20 + $0x8] sm:$0xff] %v4417_v20   ;;  %v3824_v29 = vadd.f32 %v3792_v38, %v3684_v47  ;;  %v3687_v31 = vadd.f32 %v5271_v27, %v6459_v51  ;;  %v3678_v40 = vpop.f32.mrb[71].mxu0 }
 0x40b   : > { %4413 = vst [vmem:[%s6473_s20] sm:$0xff] %v4412_v41   ;;  %v3822_v54 = vadd.f32 %v3790_v39, %v3676_v42  ;;  %v3679_v48 = vadd.f32 %v6459_v51, %v3678_v40 }
 0x40c   : > { %v3825_v6 = vadd.f32 %v3793_v23, %v3687_v31  ;;  %v3856_v49 = vmax.f32 %v3824_v29, 0.0  ;;  %v3804_v23 = vunpack.c.l.bf16 %v5706_v9 }
 0x40d   : > { %v3823_v55 = vadd.f32 %v3791_v26, %v3679_v48  ;;  %v3854_v56 = vmax.f32 %v3822_v54, 0.0  ;;  %v5707_v26 = vld [vmem:[%s5789_s12 + $0x40] sm:$0xff]   ;;  %v3805_v48 = vunpack.c.h.bf16 %v5706_v9 }
 0x40e   : > { %v3857_v50 = vmax.f32 %v3825_v6, 0.0  ;;  %v3802_v29 = vunpack.c.l.bf16 %v5707_v26 }
 0x40f   : > { %v3855_v8 = vmax.f32 %v3823_v55, 0.0  ;;  %v5274_v15 = vpop.f32.mrb[72].mxu0 }
 0x410   : > { %v4427_v46 = vpack.c.bf16 %v3857_v50, %v3856_v49  ;;  %v3700_v5 = vadd.f32 %v5274_v15, %v6459_v51  ;;  %v3691_v61 = vpop.f32.mrb[73].mxu0  ;;  %v3803_v50 = vunpack.c.h.bf16 %v5707_v26 }
 0x411   : > { %v4422_v7 = vpack.c.bf16 %v3855_v8, %v3854_v56  ;;  %v3692_v34 = vadd.f32 %v6459_v51, %v3691_v61  ;;  %v5275_v60 = vpop.f32.mrb[74].mxu0  ;;  %v5708_v61 = vld [vmem:[%s5789_s12 + $0x58] sm:$0xff]  }
 0x412   : > { %4491 = vst [vmem:[%s6473_s20 + $0x18] sm:$0xff] %v4427_v46   ;;  %v3828_v18 = vadd.f32 %v3796_v52, %v3700_v5  ;;  %v3703_v30 = vadd.f32 %v5275_v60, %v6459_v51  ;;  %v3694_v57 = vpop.f32.mrb[75].mxu0 }
 0x413   : > { %4490 = vst [vmem:[%s6473_s20 + $0x10] sm:$0xff] %v4422_v7   ;;  %v3826_v1 = vadd.f32 %v3794_v25, %v3692_v34  ;;  %v3695_v53 = vadd.f32 %v6459_v51, %v3694_v57 }
 0x414   : > { %v3829_v24 = vadd.f32 %v3797_v4, %v3703_v30  ;;  %v3860_v35 = vmax.f32 %v3828_v18, 0.0  ;;  %v3808_v4 = vunpack.c.l.bf16 %v5708_v61 }
 0x415   : > { %v3827_v62 = vadd.f32 %v3795_v16, %v3695_v53  ;;  %v3858_v11 = vmax.f32 %v3826_v1, 0.0  ;;  %v5709_v16 = vld [vmem:[%s5789_s12 + $0x50] sm:$0xff]   ;;  %v3809_v53 = vunpack.c.h.bf16 %v5708_v61 }
 0x416   : > { %v3861_v45 = vmax.f32 %v3829_v24, 0.0  ;;  %v3806_v18 = vunpack.c.l.bf16 %v5709_v16 }
 0x417   : > { %v3859_v43 = vmax.f32 %v3827_v62, 0.0  ;;  %v5278_v10 = vpop.f32.mrb[76].mxu0 }
 0x418   : > { %v4437_v36 = vpack.c.bf16 %v3861_v45, %v3860_v35  ;;  %v3716_v12 = vadd.f32 %v5278_v10, %v6459_v51  ;;  %v3707_v3 = vpop.f32.mrb[77].mxu0  ;;  %v3807_v45 = vunpack.c.h.bf16 %v5709_v16 }
 0x419   : > { %v4432_v37 = vpack.c.bf16 %v3859_v43, %v3858_v11  ;;  %v3708_v14 = vadd.f32 %v6459_v51, %v3707_v3  ;;  %v5279_v59 = vpop.f32.mrb[78].mxu0  ;;  %v5710_v3 = vld [vmem:[%s5789_s12 + $0x68] sm:$0xff]  }
 0x41a   : > { %4493 = vst [vmem:[%s6473_s20 + $0x28] sm:$0xff] %v4437_v36   ;;  %v3832_v17 = vadd.f32 %v3800_v63, %v3716_v12  ;;  %v3719_v38 = vadd.f32 %v5279_v59, %v6459_v51  ;;  %v3710_v2 = vpop.f32.mrb[79].mxu0 }
 0x41b   : > { %4492 = vst [vmem:[%s6473_s20 + $0x20] sm:$0xff] %v4432_v37   ;;  %v3830_v21 = vadd.f32 %v3798_v28, %v3708_v14  ;;  %v3711_v0 = vadd.f32 %v6459_v51, %v3710_v2 }
 0x41c   : > { %v3833_v19 = vadd.f32 %v3801_v13, %v3719_v38  ;;  %v3864_v20 = vmax.f32 %v3832_v17, 0.0  ;;  %v3812_v13 = vunpack.c.l.bf16 %v5710_v3 }
 0x41d   : > { %v3831_v39 = vadd.f32 %v3799_v33, %v3711_v0  ;;  %v3862_v41 = vmax.f32 %v3830_v21, 0.0  ;;  %v5711_v33 = vld [vmem:[%s5789_s12 + $0x60] sm:$0xff]   ;;  %v3813_v0 = vunpack.c.h.bf16 %v5710_v3 }
 0x41e   : > { %v3865_v47 = vmax.f32 %v3833_v19, 0.0  ;;  %v3810_v17 = vunpack.c.l.bf16 %v5711_v33 }
 0x41f   : > { %v3863_v42 = vmax.f32 %v3831_v39, 0.0  ;;  %v5282_v27 = vpop.f32.mrb[80].mxu0 }
 0x420   : > { %v4447_v31 = vpack.c.bf16 %v3865_v47, %v3864_v20  ;;  %v3732_v40 = vadd.f32 %v5282_v27, %v6459_v51  ;;  %v3723_v54 = vpop.f32.mrb[81].mxu0  ;;  %v3811_v47 = vunpack.c.h.bf16 %v5711_v33 }
 0x421   : > { %v4442_v6 = vpack.c.bf16 %v3863_v42, %v3862_v41  ;;  %v3724_v55 = vadd.f32 %v6459_v51, %v3723_v54  ;;  %v5283_v49 = vpop.f32.mrb[82].mxu0  ;;  %v5712_v54 = vld [vmem:[%s5789_s12 + $0x78] sm:$0xff]  }
 0x422   : > { %4495 = vst [vmem:[%s6473_s20 + $0x38] sm:$0xff] %v4447_v31   ;;  %v3836_v44 = vadd.f32 %v3804_v23, %v3732_v40  ;;  %v3735_v52 = vadd.f32 %v5283_v49, %v6459_v51  ;;  %v3726_v56 = vpop.f32.mrb[83].mxu0 }
 0x423   : > { %4494 = vst [vmem:[%s6473_s20 + $0x30] sm:$0xff] %v4442_v6   ;;  %v3834_v8 = vadd.f32 %v3802_v29, %v3724_v55  ;;  %v3727_v15 = vadd.f32 %v6459_v51, %v3726_v56 }
 0x424   : > { %v3837_v22 = vadd.f32 %v3805_v48, %v3735_v52  ;;  %v3868_v46 = vmax.f32 %v3836_v44, 0.0  ;;  %v3816_v48 = vunpack.c.l.bf16 %v5712_v54 }
 0x425   : > { %v3835_v25 = vadd.f32 %v3803_v50, %v3727_v15  ;;  %v3866_v7 = vmax.f32 %v3834_v8, 0.0  ;;  %v5713_v50 = vld [vmem:[%s5789_s12 + $0x70] sm:$0xff]   ;;  %v3817_v15 = vunpack.c.h.bf16 %v5712_v54 }
 0x426   : > { %v3869_v5 = vmax.f32 %v3837_v22, 0.0  ;;  %v3814_v44 = vunpack.c.l.bf16 %v5713_v50 }
 0x427   : > { %v3867_v34 = vmax.f32 %v3835_v25, 0.0  ;;  %v5286_v60 = vpop.f32.mrb[84].mxu0 }
 0x428   : > { %v4457_v30 = vpack.c.bf16 %v3869_v5, %v3868_v46  ;;  %v3748_v57 = vadd.f32 %v5286_v60, %v6459_v51  ;;  %v3739_v1 = vpop.f32.mrb[85].mxu0  ;;  %v3815_v5 = vunpack.c.h.bf16 %v5713_v50 }
 0x429   : > { %v4452_v24 = vpack.c.bf16 %v3867_v34, %v3866_v7  ;;  %v3740_v62 = vadd.f32 %v6459_v51, %v3739_v1  ;;  %v5287_v35 = vpop.f32.mrb[86].mxu0 }
 0x42a   : > { %4497 = vst [vmem:[%s6473_s20 + $0x48] sm:$0xff] %v4457_v30   ;;  %v3840_v58 = vadd.f32 %v3808_v4, %v3748_v57  ;;  %v3751_v63 = vadd.f32 %v5287_v35, %v6459_v51  ;;  %v3742_v11 = vpop.f32.mrb[87].mxu0 }
 0x42b   : > { %4496 = vst [vmem:[%s6473_s20 + $0x40] sm:$0xff] %v4452_v24   ;;  %v3838_v43 = vadd.f32 %v3806_v18, %v3740_v62  ;;  %v3743_v10 = vadd.f32 %v6459_v51, %v3742_v11 }
 0x42c   : > { %v3841_v32 = vadd.f32 %v3809_v53, %v3751_v63  ;;  %v3872_v36 = vmax.f32 %v3840_v58, 0.0 }
 0x42d   : > { %v3839_v28 = vadd.f32 %v3807_v45, %v3743_v10  ;;  %v3870_v37 = vmax.f32 %v3838_v43, 0.0 }
 0x42e   : > { %v3873_v12 = vmax.f32 %v3841_v32, 0.0 }
 0x42f   : > { %v3871_v14 = vmax.f32 %v3839_v28, 0.0  ;;  %v5290_v59 = vpop.f32.mrb[88].mxu0 }
 0x430   : > { %v4467_v38 = vpack.c.bf16 %v3873_v12, %v3872_v36  ;;  %v3764_v2 = vadd.f32 %v5290_v59, %v6459_v51  ;;  %v3755_v21 = vpop.f32.mrb[89].mxu0 }
 0x431   : > { %v4462_v19 = vpack.c.bf16 %v3871_v14, %v3870_v37  ;;  %v3756_v39 = vadd.f32 %v6459_v51, %v3755_v21  ;;  %v5291_v20 = vpop.f32.mrb[90].mxu0 }
 0x432   : > { %4499 = vst [vmem:[%s6473_s20 + $0x58] sm:$0xff] %v4467_v38   ;;  %v3844_v9 = vadd.f32 %v3812_v13, %v3764_v2  ;;  %v3767_v23 = vadd.f32 %v5291_v20, %v6459_v51  ;;  %v3758_v41 = vpop.f32.mrb[91].mxu0 }
 0x433   : > { %4498 = vst [vmem:[%s6473_s20 + $0x50] sm:$0xff] %v4462_v19   ;;  %v3842_v42 = vadd.f32 %v3810_v17, %v3756_v39  ;;  %v3759_v27 = vadd.f32 %v6459_v51, %v3758_v41 }
 0x434   : > { %v3845_v26 = vadd.f32 %v3813_v0, %v3767_v23  ;;  %v3876_v31 = vmax.f32 %v3844_v9, 0.0 }
 0x435   : > { %v3843_v29 = vadd.f32 %v3811_v47, %v3759_v27  ;;  %v3874_v6 = vmax.f32 %v3842_v42, 0.0 }
 0x436   : > { %v3877_v40 = vmax.f32 %v3845_v26, 0.0 }
 0x437   : > { %v3875_v55 = vmax.f32 %v3843_v29, 0.0  ;;  %v5294_v49 = vpop.f32.mrb[92].mxu0 }
 0x438   : > { %v4477_v52 = vpack.c.bf16 %v3877_v40, %v3876_v31  ;;  %v3780_v56 = vadd.f32 %v5294_v49, %v6459_v51  ;;  %v3771_v8 = vpop.f32.mrb[93].mxu0 }
 0x439   : > { %v4472_v22 = vpack.c.bf16 %v3875_v55, %v3874_v6  ;;  %v3772_v25 = vadd.f32 %v6459_v51, %v3771_v8  ;;  %v5295_v46 = vpop.f32.mrb[94].mxu0 }
 0x43a   : > { %4501 = vst [vmem:[%s6473_s20 + $0x68] sm:$0xff] %v4477_v52   ;;  %v3848_v61 = vadd.f32 %v3816_v48, %v3780_v56  ;;  %v3783_v4 = vadd.f32 %v5295_v46, %v6459_v51  ;;  %v3774_v7 = vpop.f32.mrb[95].mxu0 }
 0x43b   : > { %4500 = vst [vmem:[%s6473_s20 + $0x60] sm:$0xff] %v4472_v22   ;;  %v3846_v34 = vadd.f32 %v3814_v44, %v3772_v25  ;;  %v3775_v60 = vadd.f32 %v6459_v51, %v3774_v7 }
 0x43c   : > { %v3849_v16 = vadd.f32 %v3817_v15, %v3783_v4  ;;  %v3880_v30 = vmax.f32 %v3848_v61, 0.0 }
 0x43d   : > { %v3847_v18 = vadd.f32 %v3815_v5, %v3775_v60  ;;  %v3878_v1 = vmax.f32 %v3846_v34, 0.0 }
 0x43e   : > { %v3881_v57 = vmax.f32 %v3849_v16, 0.0 }
 0x43f   : > { %v3879_v53 = vmax.f32 %v3847_v18, 0.0 }
 0x440   : > { %v4487_v24 = vpack.c.bf16 %v3881_v57, %v3880_v30 }
 0x441   : > { %v4482_v62 = vpack.c.bf16 %v3879_v53, %v3878_v1 }
 0x442   : > { %4503 = vst [vmem:[%s6473_s20 + $0x78] sm:$0xff] %v4487_v24  }
 0x443   : > { %4502 = vst [vmem:[%s6473_s20 + $0x70] sm:$0xff] %v4482_v62  }
 0x444 PF: > { %s17_s24 = sadd.s32 1, %s5720_s24  }
 0x445   : > { %p14_p4 = scmp.ge.s32.totalorder %s17_s24, 4  }
 0x447   :  { %16 = sbr.rel (!%p14_p4) target bundleno = 1 (0x1), region = 88 }

</bundles_post_ra>
